<compile_context>
chip_gen: v6e
topology: v6e:2x2x1
jax: 0.10.0
libtpu: 0.0.40
codegen_flags: <defaults>
</compile_context>

<pallas_src>
import jax
import jax.numpy as jnp
from jax.experimental import pallas as pl
from jax.experimental.pallas import tpu as pltpu


def _rep_basic_unit_kernel(x_ref, w_pw_ref, b_pw_ref, w_dw_ref, b_dw_ref,
                           w_ca_ref, b_ca_ref, o_ref):
    """Fused RepBasicUnit forward for one batch element (block = full image).

    x_ref : (1, C_in, H, W)  VMEM
    o_ref : (1, C_out, H, W) VMEM
    w_pw  : (Cr_in, Cr_out)  SMEM   1x1 conv weight (deploy form)
    b_pw  : (Cr_out,)        SMEM
    w_dw  : (Cr_out, 9)      SMEM   depthwise 3x3 weight, taps row-major
    b_dw  : (Cr_out,)        SMEM
    w_ca  : (C_out, C_out)   SMEM   channel-attention FC weight
    b_ca  : (C_out,)         SMEM
    """
    _, c_in, H, W = x_ref.shape
    _, c_out, _, _ = o_ref.shape
    cr_out = w_dw_ref.shape[0]
    left = c_out - cr_out
    cr_in = c_in - left
    f32 = jnp.float32

    # Load the right-branch input planes once; W rides the lane dim.
    xr = [x_ref[0, left + ci, :, :].astype(f32) for ci in range(cr_in)]

    zrow = jnp.zeros((1, W), f32)
    zcol = jnp.zeros((H + 2, 1), f32)

    dw_planes = []
    for co in range(cr_out):
        # --- RepConv(k=1): pointwise conv + bias + ReLU as VPU broadcast FMAs.
        #     (MXU is pointless at these channel counts; module is HBM-bound.)
        acc = jnp.full((H, W), b_pw_ref[co], f32)
        for ci in range(cr_in):
            acc = acc + xr[ci] * w_pw_ref[ci, co]
        pw = jnp.maximum(acc, 0.0)

        # --- zero-pad by 1 in H and W entirely in VMEM/vregs (no HBM pad copy).
        xp = jnp.concatenate([zrow, pw, zrow], axis=0)      # (H+2, W)
        xp = jnp.concatenate([zcol, xp, zcol], axis=1)      # (H+2, W+2)

        # --- RepConv(k=3, padding=1, groups=Cr_out): depthwise 3x3 + bias + ReLU.
        dacc = jnp.full((H, W), b_dw_ref[co], f32)
        for dy in range(3):
            for dx in range(3):
                dacc = dacc + xp[dy:dy + H, dx:dx + W] * w_dw_ref[co, dy * 3 + dx]
        dw_planes.append(jnp.maximum(dacc, 0.0))

    # --- ChannelAttension on concat(left, dw); the concat is never materialized.
    y_planes = [x_ref[0, c, :, :].astype(f32) for c in range(left)] + dw_planes

    inv_hw = 1.0 / float(H * W)
    gap = []
    for p in y_planes:                                      # global avg pool
        s = jnp.sum(p, axis=1, keepdims=True)               # (H, 1) lane reduce
        s = jnp.sum(s, axis=0, keepdims=True)               # (1, 1) sublane reduce
        gap.append(s * inv_hw)

    for c in range(c_out):
        logit = jnp.full((1, 1), b_ca_ref[c], f32)
        for k in range(c_out):
            logit = logit + gap[k] * w_ca_ref[k, c]
        att = jax.nn.sigmoid(logit)                         # (1, 1), EUP
        o_ref[0, c, :, :] = (y_planes[c] * att).astype(o_ref.dtype)


def rep_basic_unit(x_nchw, params, in_channels, out_channels):
    """RepBasicUnit forward. x_nchw: (N, C_in, H, W) f32 -> (N, C_out, H, W)."""
    N, C, H, W = x_nchw.shape
    assert C == in_channels
    left = in_channels // 2
    cr_out = out_channels - left
    assert cr_out >= 1

    # VMEM budget: double-buffered input+output blocks plus live intermediates.
    # Re-derive per generation (v7x has 64 MiB VMEM vs 128 on v5e/v6e).
    est = 4 * H * W * (2 * in_channels + 3 * out_channels + cr_out) + (4 << 20)
    vmem_limit = int(min(max(est, 32 << 20), 64 << 20))

    smem = pl.BlockSpec(memory_space=pltpu.MemorySpace.SMEM)
    fn = pl.pallas_call(
        _rep_basic_unit_kernel,
        out_shape=jax.ShapeDtypeStruct((N, out_channels, H, W), x_nchw.dtype),
        grid=(N,),
        in_specs=[
            pl.BlockSpec((1, in_channels, H, W), lambda n: (n, 0, 0, 0)),
            smem, smem, smem, smem, smem, smem,
        ],
        out_specs=pl.BlockSpec((1, out_channels, H, W), lambda n: (n, 0, 0, 0)),
        compiler_params=pltpu.CompilerParams(
            dimension_semantics=("parallel",),
            vmem_limit_bytes=vmem_limit,
        ),
    )
    return fn(x_nchw, params["w_pw"], params["b_pw"], params["w_dw"],
              params["b_dw"], params["w_ca"], params["b_ca"])


def init_params(key, in_channels, out_channels):
    left = in_channels // 2
    r_in = in_channels - left
    r_out = out_channels - left
    ks = jax.random.split(key, 6)
    return {
        "w_pw": 0.1 * jax.random.normal(ks[0], (r_in, r_out), jnp.float32),
        "b_pw": 0.1 * jax.random.normal(ks[1], (r_out,), jnp.float32),
        "w_dw": 0.1 * jax.random.normal(ks[2], (r_out, 9), jnp.float32),
        "b_dw": 0.1 * jax.random.normal(ks[3], (r_out,), jnp.float32),
        "w_ca": 0.1 * jax.random.normal(ks[4], (out_channels, out_channels), jnp.float32),
        "b_ca": 0.1 * jax.random.normal(ks[5], (out_channels,), jnp.float32),
    }


# ----------------------------------------------------------------------------
# Pure-JAX reference (same math, NCHW) for a sanity check.
# ----------------------------------------------------------------------------
def rep_basic_unit_ref(x, params, in_channels, out_channels):
    left = in_channels // 2
    N, C, H, W = x.shape
    xl = x[:, :left]
    xr = x[:, left:]

    pw = jnp.einsum("nchw,co->nohw", xr, params["w_pw"]) \
        + params["b_pw"][None, :, None, None]
    pw = jnp.maximum(pw, 0.0)

    xp = jnp.pad(pw, ((0, 0), (0, 0), (1, 1), (1, 1)))
    acc = jnp.zeros_like(pw)
    for dy in range(3):
        for dx in range(3):
            w_tap = params["w_dw"][:, dy * 3 + dx][None, :, None, None]
            acc = acc + xp[:, :, dy:dy + H, dx:dx + W] * w_tap
    dw = jnp.maximum(acc + params["b_dw"][None, :, None, None], 0.0)

    y = jnp.concatenate([xl, dw], axis=1)
    gap = jnp.mean(y, axis=(2, 3))
    att = jax.nn.sigmoid(gap @ params["w_ca"] + params["b_ca"][None, :])
    return y * att[:, :, None, None]


if __name__ == "__main__":
    in_channels, out_channels = 4, 4
    N, H, W = 2, 16, 16

    key = jax.random.PRNGKey(0)
    kx, kp = jax.random.split(key)
    x = jax.random.normal(kx, (N, in_channels, H, W), jnp.float32)
    params = init_params(kp, in_channels, out_channels)

    out = rep_basic_unit(x, params, in_channels, out_channels)
    out = jax.block_until_ready(out)

    ref = rep_basic_unit_ref(x, params, in_channels, out_channels)
    assert out.shape == (N, out_channels, H, W)
    assert jnp.allclose(out, ref, rtol=1e-4, atol=1e-4), "mismatch vs reference"

    print("KERNEL_OK")
</pallas_src>

<mosaic_0001>
module attributes {stable_mosaic.version = 11 : i64} {
  func.func @_rep_basic_unit_kernel(%arg0: i32, %arg1: memref<1x4x16x16xf32, #tpu.memory_space<vmem>>, %arg2: memref<2x2xf32, #tpu.memory_space<smem>>, %arg3: memref<2xf32, #tpu.memory_space<smem>>, %arg4: memref<2x9xf32, #tpu.memory_space<smem>>, %arg5: memref<2xf32, #tpu.memory_space<smem>>, %arg6: memref<4x4xf32, #tpu.memory_space<smem>>, %arg7: memref<4xf32, #tpu.memory_space<smem>>, %arg8: memref<1x4x16x16xf32, #tpu.memory_space<vmem>>) attributes {dimension_semantics = [#tpu.dimension_semantics<parallel>], iteration_bounds = array<i64: 2>, scalar_prefetch = 0 : i64, scratch_operands = 0 : i64, tpu.core_type = #tpu.core_type<tc>, window_params = [{transform_indices = @transform_0, window_bounds = array<i64: 1, 4, 16, 16>}, {transform_indices = @transform_1, window_bounds = array<i64: 2, 2>}, {transform_indices = @transform_2, window_bounds = array<i64: 2>}, {transform_indices = @transform_3, window_bounds = array<i64: 2, 9>}, {transform_indices = @transform_4, window_bounds = array<i64: 2>}, {transform_indices = @transform_5, window_bounds = array<i64: 4, 4>}, {transform_indices = @transform_6, window_bounds = array<i64: 4>}, {transform_indices = @transform_7, window_bounds = array<i64: 1, 4, 16, 16>}]} {
    %c0 = arith.constant 0 : index
    %c2 = arith.constant 2 : index
    %c0_0 = arith.constant 0 : index
    %c0_1 = arith.constant 0 : index
    %0 = vector.load %arg1[%c0, %c2, %c0_0, %c0_1] : memref<1x4x16x16xf32, #tpu.memory_space<vmem>>, vector<1x1x16x16xf32>
    %1 = vector.shape_cast %0 : vector<1x1x16x16xf32> to vector<16x16xf32>
    %c0_2 = arith.constant 0 : index
    %c3 = arith.constant 3 : index
    %c0_3 = arith.constant 0 : index
    %c0_4 = arith.constant 0 : index
    %2 = vector.load %arg1[%c0_2, %c3, %c0_3, %c0_4] : memref<1x4x16x16xf32, #tpu.memory_space<vmem>>, vector<1x1x16x16xf32>
    %3 = vector.shape_cast %2 : vector<1x1x16x16xf32> to vector<16x16xf32>
    %cst = arith.constant 0.000000e+00 : f32
    %4 = vector.broadcast %cst : f32 to vector<1x16xf32>
    %cst_5 = arith.constant 0.000000e+00 : f32
    %5 = vector.broadcast %cst_5 : f32 to vector<18x1xf32>
    %c0_6 = arith.constant 0 : index
    %6 = memref.load %arg3[%c0_6] : memref<2xf32, #tpu.memory_space<smem>>
    %7 = vector.broadcast %6 : f32 to vector<16x16xf32>
    %c0_7 = arith.constant 0 : index
    %c0_8 = arith.constant 0 : index
    %8 = memref.load %arg2[%c0_7, %c0_8] : memref<2x2xf32, #tpu.memory_space<smem>>
    %9 = vector.broadcast %8 : f32 to vector<16x16xf32>
    %10 = arith.mulf %1, %9 : vector<16x16xf32>
    %11 = arith.addf %7, %10 : vector<16x16xf32>
    %c1 = arith.constant 1 : index
    %c0_9 = arith.constant 0 : index
    %12 = memref.load %arg2[%c1, %c0_9] : memref<2x2xf32, #tpu.memory_space<smem>>
    %13 = vector.broadcast %12 : f32 to vector<16x16xf32>
    %14 = arith.mulf %3, %13 : vector<16x16xf32>
    %15 = arith.addf %11, %14 : vector<16x16xf32>
    %cst_10 = arith.constant 0.000000e+00 : f32
    %16 = vector.broadcast %cst_10 : f32 to vector<16x16xf32>
    %17 = arith.maximumf %15, %16 : vector<16x16xf32>
    %18 = tpu.concatenate %4, %17, %4 in 0 : vector<1x16xf32>, vector<16x16xf32>, vector<1x16xf32> -> vector<18x16xf32>
    %19 = tpu.concatenate %5, %18, %5 in 1 : vector<18x1xf32>, vector<18x16xf32>, vector<18x1xf32> -> vector<18x18xf32>
    %c0_11 = arith.constant 0 : index
    %20 = memref.load %arg5[%c0_11] : memref<2xf32, #tpu.memory_space<smem>>
    %21 = vector.broadcast %20 : f32 to vector<16x16xf32>
    %22 = vector.extract_strided_slice %19 {offsets = [0, 0], sizes = [16, 16], strides = [1, 1]} : vector<18x18xf32> to vector<16x16xf32>
    %c0_12 = arith.constant 0 : index
    %c0_13 = arith.constant 0 : index
    %23 = memref.load %arg4[%c0_12, %c0_13] : memref<2x9xf32, #tpu.memory_space<smem>>
    %24 = vector.broadcast %23 : f32 to vector<16x16xf32>
    %25 = arith.mulf %22, %24 : vector<16x16xf32>
    %26 = arith.addf %21, %25 : vector<16x16xf32>
    %27 = vector.extract_strided_slice %19 {offsets = [0, 1], sizes = [16, 16], strides = [1, 1]} : vector<18x18xf32> to vector<16x16xf32>
    %c0_14 = arith.constant 0 : index
    %c1_15 = arith.constant 1 : index
    %28 = memref.load %arg4[%c0_14, %c1_15] : memref<2x9xf32, #tpu.memory_space<smem>>
    %29 = vector.broadcast %28 : f32 to vector<16x16xf32>
    %30 = arith.mulf %27, %29 : vector<16x16xf32>
    %31 = arith.addf %26, %30 : vector<16x16xf32>
    %32 = vector.extract_strided_slice %19 {offsets = [0, 2], sizes = [16, 16], strides = [1, 1]} : vector<18x18xf32> to vector<16x16xf32>
    %c0_16 = arith.constant 0 : index
    %c2_17 = arith.constant 2 : index
    %33 = memref.load %arg4[%c0_16, %c2_17] : memref<2x9xf32, #tpu.memory_space<smem>>
    %34 = vector.broadcast %33 : f32 to vector<16x16xf32>
    %35 = arith.mulf %32, %34 : vector<16x16xf32>
    %36 = arith.addf %31, %35 : vector<16x16xf32>
    %37 = vector.extract_strided_slice %19 {offsets = [1, 0], sizes = [16, 16], strides = [1, 1]} : vector<18x18xf32> to vector<16x16xf32>
    %c0_18 = arith.constant 0 : index
    %c3_19 = arith.constant 3 : index
    %38 = memref.load %arg4[%c0_18, %c3_19] : memref<2x9xf32, #tpu.memory_space<smem>>
    %39 = vector.broadcast %38 : f32 to vector<16x16xf32>
    %40 = arith.mulf %37, %39 : vector<16x16xf32>
    %41 = arith.addf %36, %40 : vector<16x16xf32>
    %42 = vector.extract_strided_slice %19 {offsets = [1, 1], sizes = [16, 16], strides = [1, 1]} : vector<18x18xf32> to vector<16x16xf32>
    %c0_20 = arith.constant 0 : index
    %c4 = arith.constant 4 : index
    %43 = memref.load %arg4[%c0_20, %c4] : memref<2x9xf32, #tpu.memory_space<smem>>
    %44 = vector.broadcast %43 : f32 to vector<16x16xf32>
    %45 = arith.mulf %42, %44 : vector<16x16xf32>
    %46 = arith.addf %41, %45 : vector<16x16xf32>
    %47 = vector.extract_strided_slice %19 {offsets = [1, 2], sizes = [16, 16], strides = [1, 1]} : vector<18x18xf32> to vector<16x16xf32>
    %c0_21 = arith.constant 0 : index
    %c5 = arith.constant 5 : index
    %48 = memref.load %arg4[%c0_21, %c5] : memref<2x9xf32, #tpu.memory_space<smem>>
    %49 = vector.broadcast %48 : f32 to vector<16x16xf32>
    %50 = arith.mulf %47, %49 : vector<16x16xf32>
    %51 = arith.addf %46, %50 : vector<16x16xf32>
    %52 = vector.extract_strided_slice %19 {offsets = [2, 0], sizes = [16, 16], strides = [1, 1]} : vector<18x18xf32> to vector<16x16xf32>
    %c0_22 = arith.constant 0 : index
    %c6 = arith.constant 6 : index
    %53 = memref.load %arg4[%c0_22, %c6] : memref<2x9xf32, #tpu.memory_space<smem>>
    %54 = vector.broadcast %53 : f32 to vector<16x16xf32>
    %55 = arith.mulf %52, %54 : vector<16x16xf32>
    %56 = arith.addf %51, %55 : vector<16x16xf32>
    %57 = vector.extract_strided_slice %19 {offsets = [2, 1], sizes = [16, 16], strides = [1, 1]} : vector<18x18xf32> to vector<16x16xf32>
    %c0_23 = arith.constant 0 : index
    %c7 = arith.constant 7 : index
    %58 = memref.load %arg4[%c0_23, %c7] : memref<2x9xf32, #tpu.memory_space<smem>>
    %59 = vector.broadcast %58 : f32 to vector<16x16xf32>
    %60 = arith.mulf %57, %59 : vector<16x16xf32>
    %61 = arith.addf %56, %60 : vector<16x16xf32>
    %62 = vector.extract_strided_slice %19 {offsets = [2, 2], sizes = [16, 16], strides = [1, 1]} : vector<18x18xf32> to vector<16x16xf32>
    %c0_24 = arith.constant 0 : index
    %c8 = arith.constant 8 : index
    %63 = memref.load %arg4[%c0_24, %c8] : memref<2x9xf32, #tpu.memory_space<smem>>
    %64 = vector.broadcast %63 : f32 to vector<16x16xf32>
    %65 = arith.mulf %62, %64 : vector<16x16xf32>
    %66 = arith.addf %61, %65 : vector<16x16xf32>
    %cst_25 = arith.constant 0.000000e+00 : f32
    %67 = vector.broadcast %cst_25 : f32 to vector<16x16xf32>
    %68 = arith.maximumf %66, %67 : vector<16x16xf32>
    %c1_26 = arith.constant 1 : index
    %69 = memref.load %arg3[%c1_26] : memref<2xf32, #tpu.memory_space<smem>>
    %70 = vector.broadcast %69 : f32 to vector<16x16xf32>
    %c0_27 = arith.constant 0 : index
    %c1_28 = arith.constant 1 : index
    %71 = memref.load %arg2[%c0_27, %c1_28] : memref<2x2xf32, #tpu.memory_space<smem>>
    %72 = vector.broadcast %71 : f32 to vector<16x16xf32>
    %73 = arith.mulf %1, %72 : vector<16x16xf32>
    %74 = arith.addf %70, %73 : vector<16x16xf32>
    %c1_29 = arith.constant 1 : index
    %c1_30 = arith.constant 1 : index
    %75 = memref.load %arg2[%c1_29, %c1_30] : memref<2x2xf32, #tpu.memory_space<smem>>
    %76 = vector.broadcast %75 : f32 to vector<16x16xf32>
    %77 = arith.mulf %3, %76 : vector<16x16xf32>
    %78 = arith.addf %74, %77 : vector<16x16xf32>
    %cst_31 = arith.constant 0.000000e+00 : f32
    %79 = vector.broadcast %cst_31 : f32 to vector<16x16xf32>
    %80 = arith.maximumf %78, %79 : vector<16x16xf32>
    %81 = tpu.concatenate %4, %80, %4 in 0 : vector<1x16xf32>, vector<16x16xf32>, vector<1x16xf32> -> vector<18x16xf32>
    %82 = tpu.concatenate %5, %81, %5 in 1 : vector<18x1xf32>, vector<18x16xf32>, vector<18x1xf32> -> vector<18x18xf32>
    %c1_32 = arith.constant 1 : index
    %83 = memref.load %arg5[%c1_32] : memref<2xf32, #tpu.memory_space<smem>>
    %84 = vector.broadcast %83 : f32 to vector<16x16xf32>
    %85 = vector.extract_strided_slice %82 {offsets = [0, 0], sizes = [16, 16], strides = [1, 1]} : vector<18x18xf32> to vector<16x16xf32>
    %c1_33 = arith.constant 1 : index
    %c0_34 = arith.constant 0 : index
    %86 = memref.load %arg4[%c1_33, %c0_34] : memref<2x9xf32, #tpu.memory_space<smem>>
    %87 = vector.broadcast %86 : f32 to vector<16x16xf32>
    %88 = arith.mulf %85, %87 : vector<16x16xf32>
    %89 = arith.addf %84, %88 : vector<16x16xf32>
    %90 = vector.extract_strided_slice %82 {offsets = [0, 1], sizes = [16, 16], strides = [1, 1]} : vector<18x18xf32> to vector<16x16xf32>
    %c1_35 = arith.constant 1 : index
    %c1_36 = arith.constant 1 : index
    %91 = memref.load %arg4[%c1_35, %c1_36] : memref<2x9xf32, #tpu.memory_space<smem>>
    %92 = vector.broadcast %91 : f32 to vector<16x16xf32>
    %93 = arith.mulf %90, %92 : vector<16x16xf32>
    %94 = arith.addf %89, %93 : vector<16x16xf32>
    %95 = vector.extract_strided_slice %82 {offsets = [0, 2], sizes = [16, 16], strides = [1, 1]} : vector<18x18xf32> to vector<16x16xf32>
    %c1_37 = arith.constant 1 : index
    %c2_38 = arith.constant 2 : index
    %96 = memref.load %arg4[%c1_37, %c2_38] : memref<2x9xf32, #tpu.memory_space<smem>>
    %97 = vector.broadcast %96 : f32 to vector<16x16xf32>
    %98 = arith.mulf %95, %97 : vector<16x16xf32>
    %99 = arith.addf %94, %98 : vector<16x16xf32>
    %100 = vector.extract_strided_slice %82 {offsets = [1, 0], sizes = [16, 16], strides = [1, 1]} : vector<18x18xf32> to vector<16x16xf32>
    %c1_39 = arith.constant 1 : index
    %c3_40 = arith.constant 3 : index
    %101 = memref.load %arg4[%c1_39, %c3_40] : memref<2x9xf32, #tpu.memory_space<smem>>
    %102 = vector.broadcast %101 : f32 to vector<16x16xf32>
    %103 = arith.mulf %100, %102 : vector<16x16xf32>
    %104 = arith.addf %99, %103 : vector<16x16xf32>
    %105 = vector.extract_strided_slice %82 {offsets = [1, 1], sizes = [16, 16], strides = [1, 1]} : vector<18x18xf32> to vector<16x16xf32>
    %c1_41 = arith.constant 1 : index
    %c4_42 = arith.constant 4 : index
    %106 = memref.load %arg4[%c1_41, %c4_42] : memref<2x9xf32, #tpu.memory_space<smem>>
    %107 = vector.broadcast %106 : f32 to vector<16x16xf32>
    %108 = arith.mulf %105, %107 : vector<16x16xf32>
    %109 = arith.addf %104, %108 : vector<16x16xf32>
    %110 = vector.extract_strided_slice %82 {offsets = [1, 2], sizes = [16, 16], strides = [1, 1]} : vector<18x18xf32> to vector<16x16xf32>
    %c1_43 = arith.constant 1 : index
    %c5_44 = arith.constant 5 : index
    %111 = memref.load %arg4[%c1_43, %c5_44] : memref<2x9xf32, #tpu.memory_space<smem>>
    %112 = vector.broadcast %111 : f32 to vector<16x16xf32>
    %113 = arith.mulf %110, %112 : vector<16x16xf32>
    %114 = arith.addf %109, %113 : vector<16x16xf32>
    %115 = vector.extract_strided_slice %82 {offsets = [2, 0], sizes = [16, 16], strides = [1, 1]} : vector<18x18xf32> to vector<16x16xf32>
    %c1_45 = arith.constant 1 : index
    %c6_46 = arith.constant 6 : index
    %116 = memref.load %arg4[%c1_45, %c6_46] : memref<2x9xf32, #tpu.memory_space<smem>>
    %117 = vector.broadcast %116 : f32 to vector<16x16xf32>
    %118 = arith.mulf %115, %117 : vector<16x16xf32>
    %119 = arith.addf %114, %118 : vector<16x16xf32>
    %120 = vector.extract_strided_slice %82 {offsets = [2, 1], sizes = [16, 16], strides = [1, 1]} : vector<18x18xf32> to vector<16x16xf32>
    %c1_47 = arith.constant 1 : index
    %c7_48 = arith.constant 7 : index
    %121 = memref.load %arg4[%c1_47, %c7_48] : memref<2x9xf32, #tpu.memory_space<smem>>
    %122 = vector.broadcast %121 : f32 to vector<16x16xf32>
    %123 = arith.mulf %120, %122 : vector<16x16xf32>
    %124 = arith.addf %119, %123 : vector<16x16xf32>
    %125 = vector.extract_strided_slice %82 {offsets = [2, 2], sizes = [16, 16], strides = [1, 1]} : vector<18x18xf32> to vector<16x16xf32>
    %c1_49 = arith.constant 1 : index
    %c8_50 = arith.constant 8 : index
    %126 = memref.load %arg4[%c1_49, %c8_50] : memref<2x9xf32, #tpu.memory_space<smem>>
    %127 = vector.broadcast %126 : f32 to vector<16x16xf32>
    %128 = arith.mulf %125, %127 : vector<16x16xf32>
    %129 = arith.addf %124, %128 : vector<16x16xf32>
    %cst_51 = arith.constant 0.000000e+00 : f32
    %130 = vector.broadcast %cst_51 : f32 to vector<16x16xf32>
    %131 = arith.maximumf %129, %130 : vector<16x16xf32>
    %c0_52 = arith.constant 0 : index
    %c0_53 = arith.constant 0 : index
    %c0_54 = arith.constant 0 : index
    %c0_55 = arith.constant 0 : index
    %132 = vector.load %arg1[%c0_52, %c0_53, %c0_54, %c0_55] : memref<1x4x16x16xf32, #tpu.memory_space<vmem>>, vector<1x1x16x16xf32>
    %133 = vector.shape_cast %132 : vector<1x1x16x16xf32> to vector<16x16xf32>
    %c0_56 = arith.constant 0 : index
    %c1_57 = arith.constant 1 : index
    %c0_58 = arith.constant 0 : index
    %c0_59 = arith.constant 0 : index
    %134 = vector.load %arg1[%c0_56, %c1_57, %c0_58, %c0_59] : memref<1x4x16x16xf32, #tpu.memory_space<vmem>>, vector<1x1x16x16xf32>
    %135 = vector.shape_cast %134 : vector<1x1x16x16xf32> to vector<16x16xf32>
    %cst_60 = arith.constant dense<0.000000e+00> : vector<16xf32>
    %136 = vector.multi_reduction <add>, %133, %cst_60 [1] : vector<16x16xf32> to vector<16xf32>
    %137 = vector.shape_cast %136 : vector<16xf32> to vector<16x1xf32>
    %cst_61 = arith.constant dense<0.000000e+00> : vector<1xf32>
    %138 = vector.multi_reduction <add>, %137, %cst_61 [0] : vector<16x1xf32> to vector<1xf32>
    %139 = vector.shape_cast %138 : vector<1xf32> to vector<1x1xf32>
    %cst_62 = arith.constant 3.906250e-03 : f32
    %140 = vector.broadcast %cst_62 : f32 to vector<1x1xf32>
    %141 = arith.mulf %139, %140 : vector<1x1xf32>
    %cst_63 = arith.constant dense<0.000000e+00> : vector<16xf32>
    %142 = vector.multi_reduction <add>, %135, %cst_63 [1] : vector<16x16xf32> to vector<16xf32>
    %143 = vector.shape_cast %142 : vector<16xf32> to vector<16x1xf32>
    %cst_64 = arith.constant dense<0.000000e+00> : vector<1xf32>
    %144 = vector.multi_reduction <add>, %143, %cst_64 [0] : vector<16x1xf32> to vector<1xf32>
    %145 = vector.shape_cast %144 : vector<1xf32> to vector<1x1xf32>
    %cst_65 = arith.constant 3.906250e-03 : f32
    %146 = vector.broadcast %cst_65 : f32 to vector<1x1xf32>
    %147 = arith.mulf %145, %146 : vector<1x1xf32>
    %cst_66 = arith.constant dense<0.000000e+00> : vector<16xf32>
    %148 = vector.multi_reduction <add>, %68, %cst_66 [1] : vector<16x16xf32> to vector<16xf32>
    %149 = vector.shape_cast %148 : vector<16xf32> to vector<16x1xf32>
    %cst_67 = arith.constant dense<0.000000e+00> : vector<1xf32>
    %150 = vector.multi_reduction <add>, %149, %cst_67 [0] : vector<16x1xf32> to vector<1xf32>
    %151 = vector.shape_cast %150 : vector<1xf32> to vector<1x1xf32>
    %cst_68 = arith.constant 3.906250e-03 : f32
    %152 = vector.broadcast %cst_68 : f32 to vector<1x1xf32>
    %153 = arith.mulf %151, %152 : vector<1x1xf32>
    %cst_69 = arith.constant dense<0.000000e+00> : vector<16xf32>
    %154 = vector.multi_reduction <add>, %131, %cst_69 [1] : vector<16x16xf32> to vector<16xf32>
    %155 = vector.shape_cast %154 : vector<16xf32> to vector<16x1xf32>
    %cst_70 = arith.constant dense<0.000000e+00> : vector<1xf32>
    %156 = vector.multi_reduction <add>, %155, %cst_70 [0] : vector<16x1xf32> to vector<1xf32>
    %157 = vector.shape_cast %156 : vector<1xf32> to vector<1x1xf32>
    %cst_71 = arith.constant 3.906250e-03 : f32
    %158 = vector.broadcast %cst_71 : f32 to vector<1x1xf32>
    %159 = arith.mulf %157, %158 : vector<1x1xf32>
    %c0_72 = arith.constant 0 : index
    %160 = memref.load %arg7[%c0_72] : memref<4xf32, #tpu.memory_space<smem>>
    %161 = vector.broadcast %160 : f32 to vector<1x1xf32>
    %c0_73 = arith.constant 0 : index
    %c0_74 = arith.constant 0 : index
    %162 = memref.load %arg6[%c0_73, %c0_74] : memref<4x4xf32, #tpu.memory_space<smem>>
    %163 = vector.broadcast %162 : f32 to vector<1x1xf32>
    %164 = arith.mulf %141, %163 : vector<1x1xf32>
    %165 = arith.addf %161, %164 : vector<1x1xf32>
    %c1_75 = arith.constant 1 : index
    %c0_76 = arith.constant 0 : index
    %166 = memref.load %arg6[%c1_75, %c0_76] : memref<4x4xf32, #tpu.memory_space<smem>>
    %167 = vector.broadcast %166 : f32 to vector<1x1xf32>
    %168 = arith.mulf %147, %167 : vector<1x1xf32>
    %169 = arith.addf %165, %168 : vector<1x1xf32>
    %c2_77 = arith.constant 2 : index
    %c0_78 = arith.constant 0 : index
    %170 = memref.load %arg6[%c2_77, %c0_78] : memref<4x4xf32, #tpu.memory_space<smem>>
    %171 = vector.broadcast %170 : f32 to vector<1x1xf32>
    %172 = arith.mulf %153, %171 : vector<1x1xf32>
    %173 = arith.addf %169, %172 : vector<1x1xf32>
    %c3_79 = arith.constant 3 : index
    %c0_80 = arith.constant 0 : index
    %174 = memref.load %arg6[%c3_79, %c0_80] : memref<4x4xf32, #tpu.memory_space<smem>>
    %175 = vector.broadcast %174 : f32 to vector<1x1xf32>
    %176 = arith.mulf %159, %175 : vector<1x1xf32>
    %177 = arith.addf %173, %176 : vector<1x1xf32>
    %178 = arith.negf %177 : vector<1x1xf32>
    %179 = math.exp %178 : vector<1x1xf32>
    %cst_81 = arith.constant 1.000000e+00 : f32
    %180 = vector.broadcast %cst_81 : f32 to vector<1x1xf32>
    %181 = arith.addf %180, %179 : vector<1x1xf32>
    %182 = arith.divf %180, %181 : vector<1x1xf32>
    %183 = vector.broadcast %182 : vector<1x1xf32> to vector<16x16xf32>
    %184 = arith.mulf %133, %183 : vector<16x16xf32>
    %c0_82 = arith.constant 0 : index
    %c0_83 = arith.constant 0 : index
    %c0_84 = arith.constant 0 : index
    %c0_85 = arith.constant 0 : index
    %185 = vector.load %arg8[%c0_82, %c0_83, %c0_84, %c0_85] : memref<1x4x16x16xf32, #tpu.memory_space<vmem>>, vector<1x1x16x16xf32>
    %186 = vector.shape_cast %185 : vector<1x1x16x16xf32> to vector<16x16xf32>
    %187 = vector.shape_cast %184 : vector<16x16xf32> to vector<1x1x16x16xf32>
    tpu.vector_store %arg8[%c0_82, %c0_83, %c0_84, %c0_85], %187 {strides = array<i32>} : memref<1x4x16x16xf32, #tpu.memory_space<vmem>>, vector<1x1x16x16xf32>,
    %c1_86 = arith.constant 1 : index
    %188 = memref.load %arg7[%c1_86] : memref<4xf32, #tpu.memory_space<smem>>
    %189 = vector.broadcast %188 : f32 to vector<1x1xf32>
    %c0_87 = arith.constant 0 : index
    %c1_88 = arith.constant 1 : index
    %190 = memref.load %arg6[%c0_87, %c1_88] : memref<4x4xf32, #tpu.memory_space<smem>>
    %191 = vector.broadcast %190 : f32 to vector<1x1xf32>
    %192 = arith.mulf %141, %191 : vector<1x1xf32>
    %193 = arith.addf %189, %192 : vector<1x1xf32>
    %c1_89 = arith.constant 1 : index
    %c1_90 = arith.constant 1 : index
    %194 = memref.load %arg6[%c1_89, %c1_90] : memref<4x4xf32, #tpu.memory_space<smem>>
    %195 = vector.broadcast %194 : f32 to vector<1x1xf32>
    %196 = arith.mulf %147, %195 : vector<1x1xf32>
    %197 = arith.addf %193, %196 : vector<1x1xf32>
    %c2_91 = arith.constant 2 : index
    %c1_92 = arith.constant 1 : index
    %198 = memref.load %arg6[%c2_91, %c1_92] : memref<4x4xf32, #tpu.memory_space<smem>>
    %199 = vector.broadcast %198 : f32 to vector<1x1xf32>
    %200 = arith.mulf %153, %199 : vector<1x1xf32>
    %201 = arith.addf %197, %200 : vector<1x1xf32>
    %c3_93 = arith.constant 3 : index
    %c1_94 = arith.constant 1 : index
    %202 = memref.load %arg6[%c3_93, %c1_94] : memref<4x4xf32, #tpu.memory_space<smem>>
    %203 = vector.broadcast %202 : f32 to vector<1x1xf32>
    %204 = arith.mulf %159, %203 : vector<1x1xf32>
    %205 = arith.addf %201, %204 : vector<1x1xf32>
    %206 = arith.negf %205 : vector<1x1xf32>
    %207 = math.exp %206 : vector<1x1xf32>
    %cst_95 = arith.constant 1.000000e+00 : f32
    %208 = vector.broadcast %cst_95 : f32 to vector<1x1xf32>
    %209 = arith.addf %208, %207 : vector<1x1xf32>
    %210 = arith.divf %208, %209 : vector<1x1xf32>
    %211 = vector.broadcast %210 : vector<1x1xf32> to vector<16x16xf32>
    %212 = arith.mulf %135, %211 : vector<16x16xf32>
    %c0_96 = arith.constant 0 : index
    %c1_97 = arith.constant 1 : index
    %c0_98 = arith.constant 0 : index
    %c0_99 = arith.constant 0 : index
    %213 = vector.load %arg8[%c0_96, %c1_97, %c0_98, %c0_99] : memref<1x4x16x16xf32, #tpu.memory_space<vmem>>, vector<1x1x16x16xf32>
    %214 = vector.shape_cast %213 : vector<1x1x16x16xf32> to vector<16x16xf32>
    %215 = vector.shape_cast %212 : vector<16x16xf32> to vector<1x1x16x16xf32>
    tpu.vector_store %arg8[%c0_96, %c1_97, %c0_98, %c0_99], %215 {strides = array<i32>} : memref<1x4x16x16xf32, #tpu.memory_space<vmem>>, vector<1x1x16x16xf32>,
    %c2_100 = arith.constant 2 : index
    %216 = memref.load %arg7[%c2_100] : memref<4xf32, #tpu.memory_space<smem>>
    %217 = vector.broadcast %216 : f32 to vector<1x1xf32>
    %c0_101 = arith.constant 0 : index
    %c2_102 = arith.constant 2 : index
    %218 = memref.load %arg6[%c0_101, %c2_102] : memref<4x4xf32, #tpu.memory_space<smem>>
    %219 = vector.broadcast %218 : f32 to vector<1x1xf32>
    %220 = arith.mulf %141, %219 : vector<1x1xf32>
    %221 = arith.addf %217, %220 : vector<1x1xf32>
    %c1_103 = arith.constant 1 : index
    %c2_104 = arith.constant 2 : index
    %222 = memref.load %arg6[%c1_103, %c2_104] : memref<4x4xf32, #tpu.memory_space<smem>>
    %223 = vector.broadcast %222 : f32 to vector<1x1xf32>
    %224 = arith.mulf %147, %223 : vector<1x1xf32>
    %225 = arith.addf %221, %224 : vector<1x1xf32>
    %c2_105 = arith.constant 2 : index
    %c2_106 = arith.constant 2 : index
    %226 = memref.load %arg6[%c2_105, %c2_106] : memref<4x4xf32, #tpu.memory_space<smem>>
    %227 = vector.broadcast %226 : f32 to vector<1x1xf32>
    %228 = arith.mulf %153, %227 : vector<1x1xf32>
    %229 = arith.addf %225, %228 : vector<1x1xf32>
    %c3_107 = arith.constant 3 : index
    %c2_108 = arith.constant 2 : index
    %230 = memref.load %arg6[%c3_107, %c2_108] : memref<4x4xf32, #tpu.memory_space<smem>>
    %231 = vector.broadcast %230 : f32 to vector<1x1xf32>
    %232 = arith.mulf %159, %231 : vector<1x1xf32>
    %233 = arith.addf %229, %232 : vector<1x1xf32>
    %234 = arith.negf %233 : vector<1x1xf32>
    %235 = math.exp %234 : vector<1x1xf32>
    %cst_109 = arith.constant 1.000000e+00 : f32
    %236 = vector.broadcast %cst_109 : f32 to vector<1x1xf32>
    %237 = arith.addf %236, %235 : vector<1x1xf32>
    %238 = arith.divf %236, %237 : vector<1x1xf32>
    %239 = vector.broadcast %238 : vector<1x1xf32> to vector<16x16xf32>
    %240 = arith.mulf %68, %239 : vector<16x16xf32>
    %c0_110 = arith.constant 0 : index
    %c2_111 = arith.constant 2 : index
    %c0_112 = arith.constant 0 : index
    %c0_113 = arith.constant 0 : index
    %241 = vector.load %arg8[%c0_110, %c2_111, %c0_112, %c0_113] : memref<1x4x16x16xf32, #tpu.memory_space<vmem>>, vector<1x1x16x16xf32>
    %242 = vector.shape_cast %241 : vector<1x1x16x16xf32> to vector<16x16xf32>
    %243 = vector.shape_cast %240 : vector<16x16xf32> to vector<1x1x16x16xf32>
    tpu.vector_store %arg8[%c0_110, %c2_111, %c0_112, %c0_113], %243 {strides = array<i32>} : memref<1x4x16x16xf32, #tpu.memory_space<vmem>>, vector<1x1x16x16xf32>,
    %c3_114 = arith.constant 3 : index
    %244 = memref.load %arg7[%c3_114] : memref<4xf32, #tpu.memory_space<smem>>
    %245 = vector.broadcast %244 : f32 to vector<1x1xf32>
    %c0_115 = arith.constant 0 : index
    %c3_116 = arith.constant 3 : index
    %246 = memref.load %arg6[%c0_115, %c3_116] : memref<4x4xf32, #tpu.memory_space<smem>>
    %247 = vector.broadcast %246 : f32 to vector<1x1xf32>
    %248 = arith.mulf %141, %247 : vector<1x1xf32>
    %249 = arith.addf %245, %248 : vector<1x1xf32>
    %c1_117 = arith.constant 1 : index
    %c3_118 = arith.constant 3 : index
    %250 = memref.load %arg6[%c1_117, %c3_118] : memref<4x4xf32, #tpu.memory_space<smem>>
    %251 = vector.broadcast %250 : f32 to vector<1x1xf32>
    %252 = arith.mulf %147, %251 : vector<1x1xf32>
    %253 = arith.addf %249, %252 : vector<1x1xf32>
    %c2_119 = arith.constant 2 : index
    %c3_120 = arith.constant 3 : index
    %254 = memref.load %arg6[%c2_119, %c3_120] : memref<4x4xf32, #tpu.memory_space<smem>>
    %255 = vector.broadcast %254 : f32 to vector<1x1xf32>
    %256 = arith.mulf %153, %255 : vector<1x1xf32>
    %257 = arith.addf %253, %256 : vector<1x1xf32>
    %c3_121 = arith.constant 3 : index
    %c3_122 = arith.constant 3 : index
    %258 = memref.load %arg6[%c3_121, %c3_122] : memref<4x4xf32, #tpu.memory_space<smem>>
    %259 = vector.broadcast %258 : f32 to vector<1x1xf32>
    %260 = arith.mulf %159, %259 : vector<1x1xf32>
    %261 = arith.addf %257, %260 : vector<1x1xf32>
    %262 = arith.negf %261 : vector<1x1xf32>
    %263 = math.exp %262 : vector<1x1xf32>
    %cst_123 = arith.constant 1.000000e+00 : f32
    %264 = vector.broadcast %cst_123 : f32 to vector<1x1xf32>
    %265 = arith.addf %264, %263 : vector<1x1xf32>
    %266 = arith.divf %264, %265 : vector<1x1xf32>
    %267 = vector.broadcast %266 : vector<1x1xf32> to vector<16x16xf32>
    %268 = arith.mulf %131, %267 : vector<16x16xf32>
    %c0_124 = arith.constant 0 : index
    %c3_125 = arith.constant 3 : index
    %c0_126 = arith.constant 0 : index
    %c0_127 = arith.constant 0 : index
    %269 = vector.load %arg8[%c0_124, %c3_125, %c0_126, %c0_127] : memref<1x4x16x16xf32, #tpu.memory_space<vmem>>, vector<1x1x16x16xf32>
    %270 = vector.shape_cast %269 : vector<1x1x16x16xf32> to vector<16x16xf32>
    %271 = vector.shape_cast %268 : vector<16x16xf32> to vector<1x1x16x16xf32>
    tpu.vector_store %arg8[%c0_124, %c3_125, %c0_126, %c0_127], %271 {strides = array<i32>} : memref<1x4x16x16xf32, #tpu.memory_space<vmem>>, vector<1x1x16x16xf32>,
    return
  }
  func.func @transform_0(%arg0: i32) -> (i32, i32, i32, i32) {
    %c0_i32 = arith.constant 0 : i32
    %c0_i32_0 = arith.constant 0 : i32
    %c0_i32_1 = arith.constant 0 : i32
    %c0_i32_2 = arith.constant 0 : i32
    return %arg0, %c0_i32, %c0_i32_0, %c0_i32_1 : i32, i32, i32, i32
  }
  func.func @transform_1(%arg0: i32) -> (i32, i32) {
    %c0_i32 = arith.constant 0 : i32
    %c0_i32_0 = arith.constant 0 : i32
    %c0_i32_1 = arith.constant 0 : i32
    return %c0_i32, %c0_i32_0 : i32, i32
  }
  func.func @transform_2(%arg0: i32) -> i32 {
    %c0_i32 = arith.constant 0 : i32
    %c0_i32_0 = arith.constant 0 : i32
    return %c0_i32 : i32
  }
  func.func @transform_3(%arg0: i32) -> (i32, i32) {
    %c0_i32 = arith.constant 0 : i32
    %c0_i32_0 = arith.constant 0 : i32
    %c0_i32_1 = arith.constant 0 : i32
    return %c0_i32, %c0_i32_0 : i32, i32
  }
  func.func @transform_4(%arg0: i32) -> i32 {
    %c0_i32 = arith.constant 0 : i32
    %c0_i32_0 = arith.constant 0 : i32
    return %c0_i32 : i32
  }
  func.func @transform_5(%arg0: i32) -> (i32, i32) {
    %c0_i32 = arith.constant 0 : i32
    %c0_i32_0 = arith.constant 0 : i32
    %c0_i32_1 = arith.constant 0 : i32
    return %c0_i32, %c0_i32_0 : i32, i32
  }
  func.func @transform_6(%arg0: i32) -> i32 {
    %c0_i32 = arith.constant 0 : i32
    %c0_i32_0 = arith.constant 0 : i32
    return %c0_i32 : i32
  }
  func.func @transform_7(%arg0: i32) -> (i32, i32, i32, i32) {
    %c0_i32 = arith.constant 0 : i32
    %c0_i32_0 = arith.constant 0 : i32
    %c0_i32_1 = arith.constant 0 : i32
    %c0_i32_2 = arith.constant 0 : i32
    return %arg0, %c0_i32, %c0_i32_0, %c0_i32_1 : i32, i32, i32, i32
  }
}

</mosaic_0001>

<bundles_post_ra>
// kernel: tpu_custom_call.1
= control target key start
LH: loop header
LB: loop body
LE: loop exit
PB: predicated region body
PF: predicated region fallthrough
CT: control target
= control target key end

     0   :  { %s2182_s0 = inlined_call_operand.hbm [shape: f32[2,4,16,16], index: 0, kind: input, shape index: {}]   ;;  %s2183_s1 = inlined_call_operand.hbm [shape: f32[2,2], index: 1, kind: input, shape index: {}]   ;;  %s2184_s2 = inlined_call_operand.vmem [shape: f32[2], index: 2, kind: input, shape index: {}]   ;;  %s2185_s3 = inlined_call_operand.vmem [shape: f32[2,9], index: 3, kind: input, shape index: {}]   ;;  %s2186_s4 = inlined_call_operand.hbm [shape: f32[2], index: 4, kind: input, shape index: {}]   ;;  %s2187_s5 = inlined_call_operand.vmem [shape: f32[4,4], index: 5, kind: input, shape index: {}]   ;;  %s2188_s6 = inlined_call_operand.vmem [shape: f32[4], index: 6, kind: input, shape index: {}]   ;;  %s2189_s7 = inlined_call_operand.hbm [shape: f32[2,4,16,16], index: 7, kind: output, shape index: {}]  }
   0x1   :  { %2195 = sst [smem:[#allocation25_spill]] %s2182_s0 }
   0x2   :  { %2196 = sst [smem:[#allocation26_spill]] %s2183_s1 }
   0x3   :  { %2197 = sst [smem:[#allocation27_spill]] %s2184_s2 }
   0x4   :  { %2198 = sst [smem:[#allocation28_spill]] %s2185_s3 }
   0x5   :  { %2199 = sst [smem:[#allocation29_spill]] %s2186_s4 }
   0x6   :  { %12 = vsyncpa [#allocation3], 0 }
   0x7   :  { %14 = vsyncpa [#allocation3 + $0x1], 0 }
   0x8   :  { %15 = vsyncpa [#allocation5], 0 }
   0x9   :  { %16 = vsyncpa [#allocation6], 0 }
   0xa   :  { %17 = vsyncpa [#allocation10], 0 }
   0xb   :  { %18 = vsyncpa [#allocation12], 0 }
   0xc   :  { %19 = vsyncpa [#allocation15], 0 }
   0xd   :  { %20 = vsyncpa [#allocation4], 0 }
   0xe   :  { %22 = vsyncpa [#allocation4 + $0x1], 0  ;;  %s1574_s24 = smov 0   ;;  %s1576_s25 = smov 0  }
   0xf   :  { %s1578_s26 = smov 0   ;;  %s1580_s27 = smov 0  }
  0x10 LB: > { %s2200_s3 = sld [smem:[#allocation28_spill]]  ;;  %s1598_s8 = sadd.s32 4294967295, %s1517_s27   ;;  %s1517_s27 = sphi %s1580_s27, %s2233_s27   ;;  %s1513_s26 = sphi %s1578_s26, %s2232_s26   ;;  %s1509_s25 = sphi %s1576_s25, %s2231_s25   ;;  %s1505_s24 = sphi %s1574_s24, %s2230_s24  }
  0x11   : > { %p1106_p0 = scmp.ge.s32.totalorder %s1517_s27, 1  ;;  %p2190_p1 = scmp.eq.s32.totalorder %s1598_s8, 0 }
  0x12   : > { %p211_p2 = scmp.lt.s32.totalorder %s1517_s27, 3  ;;  %s2202_s2 = sld [smem:[#allocation27_spill]] }
  0x13   : > { %s264_s16 = sshll.u32 %s2187_s5, 4  ;;  %s275_s19 = sshll.u32 %s2188_s6, 4  ;;  %s1624_s16 = int_to_ptr.vmem [resolvable:$true] %s264_s16  ;;  %s276_s19 = int_to_ptr.vmem [resolvable:$true] %s275_s19 }
  0x14   : > { %p1603_p3 = pnand %p1106_p0, %p211_p2 }
  0x16   : > { %s244_s30 = sshll.u32 %s2200_s3, 4  ;;  %p1217_p5 = pneg %p1603_p3  ;;  %s245_s30 = int_to_ptr.vmem [resolvable:$true] %s244_s30 }
  0x17   : > { %s2201_s9 = scalar_select %p1603_p3, 1, 0 }
  0x18   : > { %s233_s12 = sshll.u32 %s2202_s2, 4  ;;  %p1617_p6 = pnand %p1217_p5, %p2190_p1  ;;  %s1613_s12 = int_to_ptr.vmem [resolvable:$true] %s233_s12 }
  0x19   : > { %s1319_s20 = scalar_lea.vmem %s245_s30, 32  ;;  %p1327_p11 = scmp.lt.s32.totalorder %s245_s30, %s245_s30 }
  0x1a   : > { %p1320_p7 = scmp.ne.s32.totalorder %s245_s30, %s1319_s20  ;;  %p1321_p8 = pneg %p1617_p6 }
  0x1b   : > { %p1328_p12 = scmp.lt.s32.totalorder %s1319_s20, %s1319_s20 }
  0x1c   : > { %p1322_p9 = pnand %p1321_p8, %p1320_p7 }
  0x1d   : > { %p1329_p13 = por %p1328_p12, %p1327_p11 }
  0x1e   : > { %p1323_p10 = pneg %p1322_p9 }
  0x20   : > { %p1330_p0 = pnand %p1329_p13, %p1323_p10 }
  0x22   : > { %1333 = shalt.err (!%p1330_p0)
}
  0x23   : > { %s1519_s21 = smov [#allocation9]   ;;  %s1520_s22 = smov [#allocation7]  }
  0x24   : > { %1226 = dma.vmem_to_smem (!%p1617_p6), %s245_s30, 32, %s1519_s21, [#allocation10]  }
  0x25   : > { %s2204_s1 = sld [smem:[#allocation26_spill]]  ;;  %s1345_s29 = scalar_lea.vmem %s1613_s12, 16 }
  0x26   : > { %p1346_p2 = scmp.ne.s32.totalorder %s1613_s12, %s1345_s29  ;;  %p1353_p9 = scmp.lt.s32.totalorder %s1613_s12, %s1613_s12 }
  0x27   : > { %p1354_p10 = scmp.lt.s32.totalorder %s1345_s29, %s1345_s29 }
  0x28   : > { %p1348_p5 = pnand %p1346_p2, %p1321_p8 }
  0x29   : > { %p1355_p11 = por %p1354_p10, %p1353_p9 }
  0x2a   : > { %p1349_p7 = pneg %p1348_p5 }
  0x2b   : > { %1220 = dma.hbm_to_smem (!%p1617_p6), %s2204_s1, 32, %s1520_s22, [#allocation5]  }
  0x2c   : > { %p1356_p12 = pnand %p1355_p11, %p1349_p7 }
  0x2e   : > { %1359 = shalt.err (!%p1356_p12)
}
  0x2f   : > { %s1521_s10 = smov [#allocation8]   ;;  %s1522_s30 = smov [#allocation11]  }
  0x30   : > { %1223 = dma.vmem_to_smem (!%p1617_p6), %s1613_s12, 16, %s1521_s10, [#allocation6]  }
  0x31   : > { %s2205_s4 = sld [smem:[#allocation29_spill]]  ;;  %s1371_s15 = scalar_lea.vmem %s1624_s16, 64 }
  0x32   : > { %p1372_p13 = scmp.ne.s32.totalorder %s1624_s16, %s1371_s15  ;;  %p1379_p5 = scmp.lt.s32.totalorder %s1624_s16, %s1624_s16 }
  0x33   : > { %p1380_p7 = scmp.lt.s32.totalorder %s1371_s15, %s1371_s15 }
  0x34   : > { %p1374_p0 = pnand %p1372_p13, %p1321_p8 }
  0x35   : > { %p1381_p9 = por %p1380_p7, %p1379_p5 }
  0x36   : > { %p1375_p2 = pneg %p1374_p0 }
  0x37   : > { %1229 = dma.hbm_to_smem (!%p1617_p6), %s2205_s4, 16, %s1522_s30, [#allocation12]  }
  0x38   : > { %p1382_p10 = pnand %p1381_p9, %p1375_p2 }
  0x3a   : > { %1385 = shalt.err (!%p1382_p10)
}
  0x3b   : > { %s1523_s17 = smov [#allocation13]   ;;  %s1386_s20 = scalar_lea.vmem %s276_s19, 16 }
  0x3c   : > { %1232 = dma.vmem_to_smem (!%p1617_p6), %s1624_s16, 64, %s1523_s17, [#allocation10]  }
  0x3d   : > { %p1387_p11 = scmp.ne.s32.totalorder %s276_s19, %s1386_s20  ;;  %p1394_p0 = scmp.lt.s32.totalorder %s276_s19, %s276_s19 }
  0x3e   : > { %p1395_p2 = scmp.lt.s32.totalorder %s1386_s20, %s1386_s20 }
  0x3f   : > { %p1389_p12 = pnand %p1387_p11, %p1321_p8 }
  0x40   : > { %p1396_p5 = por %p1395_p2, %p1394_p0 }
  0x41   : > { %p1390_p13 = pneg %p1389_p12 }
  0x43   : > { %p1397_p7 = pnand %p1396_p5, %p1390_p13 }
  0x45   : > { %1400 = shalt.err (!%p1397_p7)
}
  0x46   : > { %s1524_s21 = smov [#allocation14]   ;;  %s1105_s16 = sadd.s32 4294967294, %s1517_s27  }
  0x47   : > { %1235 = dma.vmem_to_smem (!%p1617_p6), %s276_s19, 16, %s1524_s21, [#allocation15]  }
  0x48   : > { %s1677_s22 = sadd.s32 1, %s1517_s27   ;;  %s35_s23 = sadd.s32 1, %s1513_s26 }
  0x49   : > { %s32_s13 = ssub.s32 %s1517_s27, %s1677_s22  ;;  %p42_p9 = scmp.ne.s32.totalorder %s1513_s26, %s1509_s25 }
  0x4a   : > { %p33_p8 = scmp.eq.s32.totalorder %s32_s13, 0  ;;  %p43_p10 = scmp.eq.s32.totalorder %s1517_s27, 0 }
  0x4b   : > { %p48_p11 = scmp.ne.s32.totalorder %s1509_s25, %s1505_s24  ;;  %p198_p13 = scmp.eq.s32.totalorder %s1598_s8, 1 }
  0x4c   : > { %s1688_s28 = scalar_select %p33_p8, %s1513_s26, %s35_s23  }
  0x4d   : > { %p1690_p12 = por %p43_p10, %p42_p9  ;;  %p1696_p6 = por %p2190_p1, %p48_p11 }
  0x4e   : > { %p204_p0 = scmp.eq.s32.totalorder %s1105_s16, 1  ;;  %p1250_p2 = scmp.lt.s32.totalorder %s1517_s27, 2 }
  0x4f   : > { %s2207_s19 = scalar_select %p1696_p6, 1, 0 }
  0x50   : > { %s286_s10 = sand.u32 1, %s1513_s26   ;;  %p1703_p5 = por %p198_p13, %p42_p9 }
  0x51   : > { %p1707_p7 = por %p204_p0, %p48_p11  ;;  %s1114_s14 = sshll.u32 %s286_s10, 6 }
  0x52   : > { %s2208_s30 = scalar_select %p1703_p5, 1, 0 }
  0x53   : > { %s2209_s11 = scalar_select %p1707_p7, 1, 0 }
  0x54   : > { %s1187_s15 = sshll.u32 %s1517_s27, 10  ;;  %s2210_s0 = sld [smem:[#allocation25_spill]] }
  0x55   : > { %s290_s20 = scalar_lea.vmem [#allocation2], %s1114_s14  ;;  %p1721_p8 = pnand %p1250_p2, %p1690_p12 }
  0x56   : > { %s297_s21 = sshll.u32 %s290_s20, 4  ;;  %s1725_s13 = scalar_lea.sflag [#allocation3], %s286_s10  ;;  %s1717_s21 = int_to_ptr.vmem [resolvable:$true] %s297_s21 }
  0x57   : > { %p1403_p10 = pneg %p1721_p8 }
  0x5a   : > { %s1715_s18 = scalar_lea.hbm %s2210_s0, %s1187_s15  ;;  %s1406_s14 = scalar_lea.hbm %s2210_s0, 2048 }
  0x5b   : > { %s1401_s23 = scalar_lea.hbm %s1715_s18, 1024  ;;  %p1407_p12 = scmp.lt.s32.totalorder %s1715_s18, %s2210_s0 }
  0x5c   : > { %p1402_p9 = scmp.ne.s32.totalorder %s1715_s18, %s1401_s23  ;;  %p1408_p0 = scmp.lt.s32.totalorder %s1406_s14, %s1401_s23 }
  0x5e   : > { %p1404_p11 = pnand %p1403_p10, %p1402_p9  ;;  %p1409_p2 = por %p1408_p0, %p1407_p12 }
  0x60   : > { %p1405_p13 = pneg %p1404_p11 }
  0x62   : > { %p1410_p4 = pnand %p1409_p2, %p1405_p13 }
  0x64   : > { %1413 = shalt.err (!%p1410_p4)
}
  0x65   : > { %s1414_s29 = scalar_lea.vmem %s1717_s21, 1024  ;;  %s1525_s10 = smov [#allocation2]  }
  0x66   : > { %p1415_p1 = scmp.ne.s32.totalorder %s1717_s21, %s1414_s29  ;;  %s1419_s1 = sshll.u32 %s1525_s10, 4  ;;  %s1420_s1 = int_to_ptr.vmem [resolvable:$false] %s1419_s1 }
  0x67   : > { %s1421_s15 = scalar_lea.vmem %s1420_s1, 2048  ;;  %p1422_p11 = scmp.lt.s32.totalorder %s1717_s21, %s1420_s1 }
  0x68   : > { %p1417_p7 = pnand %p1415_p1, %p1403_p10  ;;  %p1423_p5 = scmp.lt.s32.totalorder %s1421_s15, %s1414_s29 }
  0x6a   : > { %p1418_p9 = pneg %p1417_p7  ;;  %p1424_p6 = por %p1423_p5, %p1422_p11 }
  0x6c   : > { %p1425_p3 = pnand %p1424_p6, %p1418_p9 }
  0x6e   : > { %1428 = shalt.err (!%p1425_p3)
}
  0x6f   : > { %s1526_s23 = smov 128   ;;  %s1527_s17 = smov 8  }
  0x70   : > { %1239 = dma.hbm_to_vmem [thread:$0]  (!%p1721_p8), %s1715_s18, 1024, %s1717_s21, %s1725_s13, %s1526_s23, %s1526_s23, %s1527_s17  }
  0x71   : > { %p2212_p1 = scmp.ne.s32.totalorder %s2201_s9, 0 }
  0x72   : > { %s1749_s14 = sand.u32 (!%p2212_p1), 1, %s1509_s25   ;;  %p2213_p3 = scmp.ne.s32.totalorder (!%p2212_p1), %s2207_s19, 0 }
  0x73   : > { %309 = sbr.rel (%p2212_p1) target bundleno = 657 (0x291), region = 48  ;;  %s2194_s1 = sshll.u32 (!%p2212_p1), %s1749_s14, 6 }
  0x74   : > { %s312_s12 = scalar_lea.sflag (!%p2212_p1), [#allocation3], %s1749_s14  ;;  %s1755_s20 = scalar_lea.vmem (!%p2212_p1), [#allocation2], %s2194_s1 }
  0x78   : > { %1472 = dma.done.wait (%p2213_p3), %s312_s12, 1024  }
  0x79   : > { %1474 = vsyncadd (%p2213_p3), %s312_s12, 4294966272  ;;  %p2214_p4 = scmp.eq.s32.totalorder %s1598_s8, 0 }
  0x7b   : > { %1476 = dma.done.wait (%p2214_p4), [#allocation5], 32   ;;  %p2215_p6 = pmov %p2214_p4 }
  0x7c   : > { %p2216_p5 = pmov %p2214_p4 }
  0x7d   : > { %1478 = vsyncadd (%p2215_p6), [#allocation5], 4294967264 }
  0x7e   : > { %1480 = dma.done.wait (%p2216_p5), [#allocation6], 16   ;;  %p2217_p7 = pmov %p2214_p4 }
  0x7f   : > { %p2218_p8 = pmov %p2214_p4 }
  0x80   : > { %1482 = vsyncadd (%p2217_p7), [#allocation6], 4294967280 }
  0x81   : > { %1484 = dma.done.wait (%p2218_p8), [#allocation10], 32   ;;  %p2219_p10 = pmov %p2214_p4 }
  0x82   : > { %p2220_p13 = pmov %p2214_p4 }
  0x83   : > { %1486 = vsyncadd (%p2219_p10), [#allocation10], 4294967264 }
  0x84   : > { %1488 = dma.done.wait (%p2220_p13), [#allocation12], 16   ;;  %p2221_p12 = pmov %p2214_p4 }
  0x85   : > { %p2222_p0 = pmov %p2214_p4 }
  0x86   : > { %1490 = vsyncadd (%p2221_p12), [#allocation12], 4294967280 }
  0x87   : > { %1492 = dma.done.wait (%p2222_p0), [#allocation10], 64   ;;  %p2223_p2 = pmov %p2222_p0 }
  0x88   : > { %p2224_p9 = pmov %p2222_p0 }
  0x89   : > { %1494 = vsyncadd (%p2223_p2), [#allocation10], 4294967232 }
  0x8a   : > { %1496 = dma.done.wait (%p2224_p9), [#allocation15], 16   ;;  %p2225_p11 = pmov %p2222_p0 }
  0x8c   : > { %1498 = vsyncadd (%p2225_p11), [#allocation15], 4294967280 }
  0x8d   : > { %344 = sfence }
  0x8e   : > { %s377_s9 = sld [smem:[#allocation8]]  ;;  %v1126_v0 = vld [vmem:[%s1755_s20 + $0x20] sm:$0xff]  ;;  %v1127_v1 = vld [vmem:[%s1755_s20 + $0x28] sm:$0xff]  ;;  %v1128_v2 = vld [vmem:[%s1755_s20 + $0x30] sm:$0xff]  ;;  %vm395_vm0 = vcmask 1040384   ;;  %s1528_s29 = smov 1  }
  0x8f   : > { %s379_s19 = sld [smem:[#allocation7]]  ;;  %v1129_v3 = vld [vmem:[%s1755_s20 + $0x38] sm:$0xff]  ;;  %vm414_vm1 = vcmask 7168   ;;  %vm418_vm2 = vcmask 138240   ;;  %vm466_vm3 = vcmask 1046528   ;;  %vm526_vm4 = vcmask 1045504  }
  0x90   : > { %s1130_s18 = sld [smem:[#allocation7 + $0x80]]  ;;  %vm783_vm5 = vcmask 130048   ;;  %p2227_p3 = scmp.ne.s32.totalorder %s2208_s30, 0 }
  0x91   : > { %s1139_s21 = sld [smem:[#allocation8 + $0x1]] }
  0x92   : > { %s1140_s16 = sld [smem:[#allocation7 + $0x1]] }
  0x93   : > { %s1141_s13 = sld [smem:[#allocation7 + $0x81]] }
  0x94   : > { %v378_v4 = vstv %s377_s9  ;;  %s1131_s10 = sld [smem:[#allocation9 + $0x1]] }
  0x95   : > { %v380_v5 = vstv %s379_s19  ;;  %s1795_s15 = sld [smem:[#allocation9 + $0x2]]  ;;  %s1529_s19 = smov 127  }
  0x96   : > { %v381_v6 = vmul.f32 %v1126_v0, %v380_v5  ;;  %v382_v7 = vmul.f32 %v1127_v1, %v380_v5  ;;  %v386_v8 = vstv %s1130_s18  ;;  %s1797_s23 = sld [smem:[#allocation9 + $0x81]] }
  0x97   : > { %v387_v9 = vmul.f32 %v1128_v2, %v386_v8  ;;  %v388_v10 = vmul.f32 %v1129_v3, %v386_v8  ;;  %v581_v13 = vstv %s1139_s21  ;;  %s1134_s17 = sld [smem:[#allocation9 + $0x4]] }
  0x98   : > { %v383_v11 = vadd.f32 %v381_v6, %v378_v4  ;;  %v384_v12 = vadd.f32 %v382_v7, %v378_v4  ;;  %v583_v14 = vstv %s1140_s16  ;;  %s1804_s12 = sld [smem:[#allocation9 + $0x82]] }
  0x99   : > { %v584_v15 = vmul.f32 %v1126_v0, %v583_v14  ;;  %v585_v16 = vmul.f32 %v1127_v1, %v583_v14  ;;  %v589_v17 = vstv %s1141_s13  ;;  %s1808_s9 = sld [smem:[#allocation9 + $0x5]]  ;;  %s1530_s13 = smov 126  }
  0x9a   : > { %v389_v18 = vadd.f32 %v387_v9, %v383_v11  ;;  %v590_v19 = vmul.f32 %v1128_v2, %v589_v17  ;;  %v591_v20 = vmul.f32 %v1129_v3, %v589_v17  ;;  %v390_v21 = vadd.f32 %v388_v10, %v384_v12  ;;  %s1812_s18 = sld [smem:[#allocation9 + $0x84]] }
  0x9b   : > { %v586_v22 = vadd.f32 %v584_v15, %v581_v13  ;;  %v587_v23 = vadd.f32 %v585_v16, %v581_v13  ;;  %v431_v41 = vstv %s1131_s10  ;;  %v445_v48 = vstv %s1795_s15  ;;  %s1821_s21 = sld [smem:[#allocation9 + $0x85]] }
  0x9c   : > { %v391_v24 = vmax.f32 %v389_v18, 0.0  ;;  %v392_v25 = vmax.f32 %v390_v21, 0.0  ;;  %v631_v52 = vstv %s1797_s23  ;;  %s1825_s16 = sld [smem:[#allocation9 + $0x7]] }
  0x9d   : > { %v592_v26 = vadd.f32 %v590_v19, %v586_v22  ;;  %v593_v27 = vadd.f32 %v591_v20, %v587_v23  ;;  %s1834_s10 = sld [smem:[#allocation9 + $0x3]]  ;;  %v477_v61 = vstv %s1134_s17 }
  0x9e   : > { %v396_v28 = vrot.slane %v391_v24, 7  ;;  %v397_v29 = vrot.slane %v392_v25, 7  ;;  %v645_v63 = vstv %s1804_s12  ;;  %s1842_s15 = sld [smem:[#allocation9 + $0x87]] }
  0x9f   : > { %v594_v30 = vmax.f32 %v592_v26, 0.0  ;;  %v595_v31 = vmax.f32 %v593_v27, 0.0  ;;  %v498_v4 = vstv %s1808_s9  ;;  %s1851_s23 = sld [smem:[#allocation9 + $0x6]] }
  0xa0   : > { %v401_v32 = vsel %vm395_vm0, 0.0, %v396_v28  ;;  %v398_v35 = vsel %vm395_vm0, %v396_v28, %v397_v29  ;;  %v402_v38 = vsel %vm395_vm0, %v397_v29, 0.0  ;;  %v676_v6 = vstv %s1812_s18  ;;  %s1855_s17 = sld [smem:[#allocation9 + $0x83]] }
  0xa1   : > { %405 = vrot.lane.b32.xlu0 %v401_v32, %s1528_s29  ;;  %v598_v33 = vrot.slane %v594_v30, 7  ;;  %v599_v34 = vrot.slane %v595_v31, 7  ;;  %v697_v9 = vstv %s1821_s21  ;;  %s1861_s12 = sld [smem:[#allocation9 + $0x86]] }
  0xa2   : > { %v537_v10 = vstv %s1825_s16  ;;  %s1915_s9 = sld [smem:[#allocation9 + $0x88]] }
  0xa3   : > { %v603_v36 = vsel %vm395_vm0, 0.0, %v598_v33  ;;  %v600_v37 = vsel %vm395_vm0, %v598_v33, %v599_v34  ;;  %v604_v39 = vsel %vm395_vm0, %v599_v34, 0.0  ;;  %v459_v22 = vstv %s1834_s10  ;;  %s422_s18 = sld [smem:[#allocation11]] }
  0xa4   : > { %607 = vrot.lane.b32.xlu1 %v603_v36, %s1528_s29  ;;  %v1888_v30 = vstv %s1842_s15  ;;  %s1143_s21 = sld [smem:[#allocation9 + $0x80]] }
  0xa5   : > { %407 = vrot.lane.b32.xlu0 %v398_v35, %s1528_s29  ;;  %s1142_s16 = sld [smem:[#allocation11 + $0x1]] }
  0xa6   : > { %s2057_s10 = sld [smem:[#allocation13 + $0x1]] }
  0xa7   : > { %s2059_s15 = sld [smem:[#allocation14 + $0x2]] }
  0xa8   : > { %609 = vrot.lane.b32.xlu1 %v600_v37, %s1528_s29  ;;  %s2077_s1 = sld [smem:[#allocation13 + $0x101]] }
  0xa9   : > { %409 = vrot.lane.b32.xlu0 %v402_v38, %s1528_s29  ;;  %v519_v38 = vstv %s1851_s23  ;;  %s2061_s23 = sld [smem:[#allocation13 + $0x2]] }
  0xaa   : > { %s2079_s0 = sld [smem:[#allocation13 + $0x102]] }
  0xab   : > { %s2081_s2 = sld [smem:[#allocation13 + $0x103]] }
  0xac   : > { %611 = vrot.lane.b32.xlu1 %v604_v39, %s1528_s29  ;;  %s1831_s29 = sld [smem:[#allocation9 + $0x8]] }
  0xad   : > { %s2085_s3 = sld [smem:[#allocation13 + $0x180]] }
  0xae   : > { %s2091_s4 = sld [smem:[#allocation13 + $0x181]] }
  0xb2   : > { %v1872_v18 = vstv %s1831_s29  ;;  %s2055_s29 = sld [smem:[#allocation14 + $0x1]] }
 0x113   : > { %v406_v40 = vpop.permute.xlu0 %405 }
 0x114   : > { %v415_v42 = vsel %vm414_vm1, 0.0, %v406_v40 }
 0x115   : > { %v1801_v43 = vsel %vm418_vm2, %v415_v42, 0.0  ;;  %v718_v42 = vstv %s1861_s12  ;;  %s2065_s12 = sld [smem:[#allocation13 + $0x3]] }
 0x116   : > { %v608_v44 = vpop.permute.xlu1 %607  ;;  %v432_v45 = vmul.f32 %v431_v41, %v1801_v43  ;;  %v446_v54 = vmul.f32 %v445_v48, %v1801_v43  ;;  %v478_v5 = vmul.f32 %v477_v61, %v1801_v43  ;;  %v499_v13 = vmul.f32 %v498_v4, %v1801_v43 }
 0x117   : > { %v616_v46 = vsel %vm414_vm1, 0.0, %v608_v44  ;;  %v408_v47 = vpop.permute.xlu0 %407  ;;  %v1884_v26 = vmul.f32 %v537_v10, %v1801_v43 }
 0x118   : > { %v416_v49 = vsel %vm414_vm1, 0.0, %v408_v47  ;;  %436 = vrot.lane.b32.xlu0 %v432_v45, %s1529_s19  ;;  %v1815_v50 = vsel %vm418_vm2, %v616_v46, 0.0  ;;  %v484_v19 = vrot.slane %v478_v5, 1  ;;  %v505_v28 = vrot.slane %v499_v13, 1 }
 0x119   : > { %v1818_v51 = vsel %vm418_vm2, %v416_v49, 0.0  ;;  %v632_v58 = vmul.f32 %v631_v52, %v1815_v50  ;;  %v646_v7 = vmul.f32 %v645_v63, %v1815_v50  ;;  %v677_v15 = vmul.f32 %v676_v6, %v1815_v50 }
 0x11a   : > { %v610_v53 = vpop.permute.xlu1 %609  ;;  %v433_v55 = vmul.f32 %v431_v41, %v1818_v51  ;;  %v447_v60 = vmul.f32 %v445_v48, %v1818_v51  ;;  %v479_v0 = vmul.f32 %v477_v61, %v1818_v51  ;;  %v500_v8 = vmul.f32 %v498_v4, %v1818_v51 }
 0x11b   : > { %v410_v56 = vpop.permute.xlu0 %409  ;;  %v617_v57 = vsel %vm414_vm1, 0.0, %v610_v53  ;;  %v698_v20 = vmul.f32 %v697_v9, %v1815_v50  ;;  %v683_v31 = vrot.slane %v677_v15, 1  ;;  %v1893_v34 = vmul.f32 %v537_v10, %v1818_v51 }
 0x11c   : > { %450 = vrot.lane.b32.xlu0 %v446_v54, %s1530_s13  ;;  %438 = vrot.lane.b32.xlu1 %v433_v55, %s1529_s19  ;;  %v417_v59 = vsel %vm414_vm1, 0.0, %v410_v56  ;;  %v1838_v62 = vsel %vm418_vm2, %v617_v57, 0.0  ;;  %v485_v12 = vrot.slane %v479_v0, 1  ;;  %v506_v25 = vrot.slane %v500_v8, 1 }
 0x11d   : > { %v1845_v1 = vsel %vm418_vm2, %v417_v59, 0.0  ;;  %v633_v3 = vmul.f32 %v631_v52, %v1838_v62  ;;  %v678_v16 = vmul.f32 %v676_v6, %v1838_v62  ;;  %v1876_v21 = vmul.f32 %v697_v9, %v1838_v62 }
 0x11e   : > { %v612_v2 = vpop.permute.xlu1 %611  ;;  %v480_v14 = vmul.f32 %v477_v61, %v1845_v1  ;;  %v501_v17 = vmul.f32 %v498_v4, %v1845_v1  ;;  %v647_v24 = vmul.f32 %v645_v63, %v1838_v62  ;;  %v486_v27 = vsel %vm466_vm3, %v484_v19, %v485_v12 }
 0x11f   : > { %v618_v11 = vsel %vm414_vm1, 0.0, %v612_v2  ;;  %v684_v32 = vrot.slane %v678_v16, 1  ;;  %v704_v35 = vrot.slane %v698_v20, 1  ;;  %v705_v36 = vrot.slane %v1876_v21, 1 }
 0x120   : > { %636 = vrot.lane.b32.xlu0 %v632_v58, %s1529_s19  ;;  %452 = vrot.lane.b32.xlu1 %v447_v60, %s1530_s13  ;;  %v1880_v23 = vsel %vm418_vm2, %v618_v11, 0.0  ;;  %v487_v29 = vrot.slane %v480_v14, 1  ;;  %v508_v33 = vrot.slane %v501_v17, 1  ;;  %v507_v39 = vsel %vm466_vm3, %v505_v28, %v506_v25 }
 0x121   : > { %v679_v37 = vmul.f32 %v676_v6, %v1880_v23  ;;  %v544_v40 = vrot.slane %v1884_v26, 2  ;;  %v659_v41 = vstv %s1855_s17  ;;  %v700_v45 = vmul.f32 %v697_v9, %v1880_v23  ;;  %s2063_s17 = sld [smem:[#allocation14 + $0x3]] }
 0x122   : > { %v488_v44 = vsel %vm466_vm3, %v485_v12, %v487_v29  ;;  %v460_v46 = vmul.f32 %v459_v22, %v1801_v43  ;;  %v461_v47 = vmul.f32 %v459_v22, %v1818_v51  ;;  %v685_v48 = vsel %vm466_vm3, %v683_v31, %v684_v32 }
 0x123   : > { %v509_v49 = vsel %vm466_vm3, %v506_v25, %v508_v33  ;;  %v545_v52 = vrot.slane %v1893_v34, 2  ;;  %v1913_v53 = vmul.f32 %v1872_v18, %v1818_v51  ;;  %v706_v54 = vsel %vm466_vm3, %v704_v35, %v705_v36 }
 0x124   : > { %650 = vrot.lane.b32.xlu0 %v646_v7, %s1530_s13  ;;  %638 = vrot.lane.b32.xlu1 %v633_v3, %s1529_s19  ;;  %v686_v55 = vrot.slane %v679_v37, 1  ;;  %v467_v56 = vrot.slane %v460_v46, 1  ;;  %v468_v57 = vrot.slane %v461_v47, 1  ;;  %v462_v58 = vmul.f32 %v459_v22, %v1845_v1 }
 0x125   : > { %v660_v59 = vmul.f32 %v659_v41, %v1815_v50  ;;  %v661_v60 = vmul.f32 %v659_v41, %v1838_v62  ;;  %v662_v61 = vmul.f32 %v659_v41, %v1880_v23  ;;  %v707_v63 = vrot.slane %v700_v45, 1 }
 0x126   : > { %v540_v0 = vmul.f32 %v537_v10, %v1845_v1  ;;  %v1926_v2 = vsel %vm466_vm3, %v467_v56, %v468_v57  ;;  %v520_v3 = vmul.f32 %v519_v38, %v1801_v43  ;;  %v470_v4 = vrot.slane %v462_v58, 1 }
 0x127   : > { %v666_v5 = vrot.slane %v660_v59, 1  ;;  %v667_v6 = vrot.slane %v661_v60, 1  ;;  %v669_v7 = vrot.slane %v662_v61, 1  ;;  %v687_v8 = vsel %vm466_vm3, %v684_v32, %v686_v55  ;;  %v2001_v59 = vld [vmem:[%s1755_s20 + $0x10] sm:$0xff]  ;;  %v2006_v61 = vld [vmem:[%s1755_s20 + $0x18] sm:$0xff] }
 0x128   : > { %489 = vrot.lane.b32.xlu0 %v486_v27, %s1529_s19  ;;  %652 = vrot.lane.b32.xlu1 %v647_v24, %s1530_s13  ;;  %v521_v9 = vmul.f32 %v519_v38, %v1818_v51  ;;  %v527_v11 = vrot.slane %v520_v3, 2  ;;  %v522_v10 = vmul.f32 %v519_v38, %v1845_v1  ;;  %v1935_v12 = vsel %vm466_vm3, %v468_v57, %v470_v4  ;;  %v1996_v57 = vld [vmem:[%s1755_s20] sm:$0xff] }
 0x129   : > { %v1938_v13 = vsel %vm466_vm3, %v666_v5, %v667_v6  ;;  %v1941_v14 = vsel %vm466_vm3, %v667_v6, %v669_v7  ;;  %v719_v15 = vmul.f32 %v718_v42, %v1815_v50  ;;  %v720_v19 = vmul.f32 %v718_v42, %v1838_v62 }
 0x12a   : > { %v528_v16 = vrot.slane %v521_v9, 2  ;;  %v530_v17 = vrot.slane %v522_v10, 2  ;;  %v721_v20 = vmul.f32 %v718_v42, %v1880_v23  ;;  %v546_v22 = vsel %vm526_vm4, %v544_v40, %v545_v52 }
 0x12b   : > { %v559_v24 = vmul.f32 %v1872_v18, %v1801_v43  ;;  %v756_v25 = vstv %s1915_s9  ;;  %v725_v26 = vrot.slane %v719_v15, 2  ;;  %v726_v29 = vrot.slane %v720_v19, 2  ;;  %s2067_s9 = sld [smem:[#allocation13 + $0x80]] }
 0x12c   : > { %510 = vrot.lane.b32.xlu0 %v507_v39, %s1530_s13  ;;  %491 = vrot.lane.b32.xlu1 %v488_v44, %s1529_s19  ;;  %v1953_v27 = vsel %vm526_vm4, %v527_v11, %v528_v16  ;;  %v1956_v28 = vsel %vm526_vm4, %v528_v16, %v530_v17  ;;  %v728_v31 = vrot.slane %v721_v20, 2  ;;  %v566_v32 = vrot.slane %v1913_v53, 2 }
 0x12d   : > { %v736_v33 = vmul.f32 %v1888_v30, %v1815_v50  ;;  %v737_v34 = vmul.f32 %v1888_v30, %v1838_v62  ;;  %v561_v35 = vmul.f32 %v1872_v18, %v1845_v1  ;;  %v708_v37 = vsel %vm466_vm3, %v705_v36, %v707_v63  ;;  %v2009_v63 = vld [vmem:[%s1755_s20 + $0x8] sm:$0xff]  ;;  %s2051_s20 = sld [smem:[#allocation14]] }
 0x12e   : > { %v547_v38 = vrot.slane %v540_v0, 2  ;;  %v1969_v39 = vsel %vm526_vm4, %v725_v26, %v726_v29  ;;  %v1972_v40 = vsel %vm526_vm4, %v726_v29, %v728_v31  ;;  %v565_v41 = vrot.slane %v559_v24, 2 }
 0x12f   : > { %v742_v44 = vrot.slane %v736_v33, 2  ;;  %v743_v1 = vrot.slane %v737_v34, 2  ;;  %v757_v18 = vmul.f32 %v756_v25, %v1815_v50  ;;  %v568_v36 = vrot.slane %v561_v35, 2 }
 0x130   : > { %688 = vrot.lane.b32.xlu0 %v685_v48, %s1529_s19  ;;  %512 = vrot.lane.b32.xlu1 %v509_v49, %s1530_s13  ;;  %v567_v42 = vsel %vm526_vm4, %v565_v41, %v566_v32  ;;  %v548_v21 = vsel %vm526_vm4, %v545_v52, %v547_v38  ;;  %v758_v45 = vmul.f32 %v756_v25, %v1838_v62  ;;  %v784_v58 = vsel %vm783_vm5, %v1996_v57, 0.0 }
 0x131   : > { %v738_v46 = vmul.f32 %v1888_v30, %v1880_v23  ;;  %v763_v47 = vrot.slane %v757_v18, 2  ;;  %v759_v48 = vmul.f32 %v756_v25, %v1880_v23  ;;  %v744_v49 = vsel %vm526_vm4, %v742_v44, %v743_v1 }
 0x132   : > { %v569_v53 = vsel %vm526_vm4, %v566_v32, %v568_v36  ;;  %v764_v52 = vrot.slane %v758_v45, 2  ;;  %v798_v60 = vsel %vm783_vm5, %v2001_v59, 0.0  ;;  %v801_v0 = vsel %vm783_vm5, %v2006_v61, 0.0 }
 0x133   : > { %v766_v56 = vrot.slane %v759_v48, 2  ;;  %v787_v3 = vsel %vm783_vm5, %v2009_v63, 0.0  ;;  %v423_v6 = vstv %s422_s18  ;;  %v625_v11 = vstv %s1143_s21  ;;  %s2071_s18 = sld [smem:[#allocation13 + $0x82]] }
 0x134   : > { %709 = vrot.lane.b32.xlu0 %v706_v54, %s1530_s13  ;;  %690 = vrot.lane.b32.xlu1 %v687_v8, %s1529_s19  ;;  %v745_v54 = vrot.slane %v738_v46, 2  ;;  %v765_v30 = vsel %vm526_vm4, %v763_v47, %v764_v52  ;;  %v626_v20 = vmul.f32 %v625_v11, %v1815_v50  ;;  %v627_v32 = vmul.f32 %v625_v11, %v1838_v62  ;;  %s2073_s21 = sld [smem:[#allocation13 + $0x83]] }
 0x135   : > { %v767_v23 = vsel %vm526_vm4, %v764_v52, %v766_v56 }
 0x136   : > { %v746_v55 = vsel %vm526_vm4, %v743_v1, %v745_v54 }
 0x138   : > { %549 = vrot.lane.b32.xlu0 %v546_v22, %s1529_s19  ;;  %711 = vrot.lane.b32.xlu1 %v708_v37, %s1530_s13  ;;  %v623_v22 = vstv %s1142_s16  ;;  %s2075_s16 = sld [smem:[#allocation13 + $0x100]] }
 0x139   : > { %v628_v31 = vadd.f32 %v626_v20, %v623_v22  ;;  %v629_v37 = vadd.f32 %v627_v32, %v623_v22 }
 0x13c   : > { %570 = vrot.lane.b32.xlu0 %v567_v42, %s1530_s13  ;;  %551 = vrot.lane.b32.xlu1 %v548_v21, %s1529_s19 }
 0x140   : > { %747 = vrot.lane.b32.xlu0 %v744_v49, %s1529_s19  ;;  %572 = vrot.lane.b32.xlu1 %v569_v53, %s1530_s13 }
 0x144   : > { %768 = vrot.lane.b32.xlu0 %v765_v30, %s1530_s13  ;;  %749 = vrot.lane.b32.xlu1 %v746_v55, %s1529_s19  ;;  %s424_s19 = sld [smem:[#allocation9]] }
 0x148   : > { %770 = vrot.lane.b32.xlu1 %v767_v23, %s1530_s13  ;;  %s2053_s13 = sld [smem:[#allocation13]] }
 0x14a   : > { %v425_v4 = vstv %s424_s19  ;;  %s2069_s19 = sld [smem:[#allocation13 + $0x81]] }
 0x14b   : > { %v426_v5 = vmul.f32 %v425_v4, %v1801_v43  ;;  %v427_v9 = vmul.f32 %v425_v4, %v1818_v51 }
 0x14d   : > { %v428_v8 = vadd.f32 %v426_v5, %v423_v6  ;;  %v429_v17 = vadd.f32 %v427_v9, %v423_v6 }
 0x163   : > { %785 = vadd.xlane.f32.xlu0 %v784_v58 }
 0x167   : > { %799 = vadd.xlane.f32.xlu0 %v798_v60 }
 0x16b   : > { %802 = vadd.xlane.f32.xlu0 %v801_v0 }
 0x16c   : > { %788 = vadd.xlane.f32.xlu1 %v787_v3 }
 0x18a   : > { %v437_v7 = vpop.permute.xlu0 %436 }
 0x18b   : > { %v442_v10 = vadd.f32 %v437_v7, %v428_v8 }
 0x18e   : > { %v439_v15 = vpop.permute.xlu1 %438  ;;  %v451_v16 = vpop.permute.xlu0 %450 }
 0x18f   : > { %v456_v19 = vadd.f32 %v451_v16, %v442_v10  ;;  %v443_v24 = vadd.f32 %v439_v15, %v429_v17 }
 0x191   : > { %v474_v25 = vadd.f32 %v1926_v2, %v456_v19 }
 0x192   : > { %v453_v26 = vpop.permute.xlu1 %452  ;;  %v637_v43 = vpop.permute.xlu0 %636 }
 0x193   : > { %v457_v29 = vadd.f32 %v453_v26, %v443_v24  ;;  %v642_v33 = vadd.f32 %v637_v43, %v628_v31 }
 0x195   : > { %v475_v51 = vadd.f32 %v1935_v12, %v457_v29 }
 0x196   : > { %v639_v34 = vpop.permute.xlu1 %638  ;;  %v651_v35 = vpop.permute.xlu0 %650 }
 0x197   : > { %v656_v38 = vadd.f32 %v651_v35, %v642_v33  ;;  %v643_v41 = vadd.f32 %v639_v34, %v629_v37 }
 0x199   : > { %v673_v50 = vadd.f32 %v1938_v13, %v656_v38 }
 0x19a   : > { %v653_v42 = vpop.permute.xlu1 %652  ;;  %v490_v44 = vpop.permute.xlu0 %489 }
 0x19b   : > { %v657_v1 = vadd.f32 %v653_v42, %v643_v41  ;;  %v495_v2 = vadd.f32 %v490_v44, %v474_v25 }
 0x19d   : > { %v674_v18 = vadd.f32 %v1941_v14, %v657_v1 }
 0x19e   : > { %v492_v21 = vpop.permute.xlu1 %491  ;;  %v511_v36 = vpop.permute.xlu0 %510 }
 0x19f   : > { %v516_v45 = vadd.f32 %v511_v36, %v495_v2  ;;  %v496_v62 = vadd.f32 %v492_v21, %v475_v51 }
 0x1a1   : > { %v534_v46 = vadd.f32 %v1953_v27, %v516_v45 }
 0x1a2   : > { %v513_v12 = vpop.permute.xlu1 %512  ;;  %v689_v47 = vpop.permute.xlu0 %688 }
 0x1a3   : > { %v517_v48 = vadd.f32 %v513_v12, %v496_v62  ;;  %v694_v49 = vadd.f32 %v689_v47, %v673_v50 }
 0x1a5   : > { %v535_v53 = vadd.f32 %v1956_v28, %v517_v48 }
 0x1a6   : > { %v691_v52 = vpop.permute.xlu1 %690  ;;  %v710_v13 = vpop.permute.xlu0 %709 }
 0x1a7   : > { %v715_v54 = vadd.f32 %v710_v13, %v694_v49  ;;  %v695_v30 = vadd.f32 %v691_v52, %v674_v18  ;;  %v841_v13 = vstv %s2051_s20  ;;  %s2094_s20 = sld [smem:[#allocation13 + $0x182]] }
 0x1a9   : > { %v732_v55 = vadd.f32 %v1969_v39, %v715_v54  ;;  %v843_v54 = vstv %s2053_s13  ;;  %s2099_s13 = sld [smem:[#allocation13 + $0x183]] }
 0x1aa   : > { %v712_v56 = vpop.permute.xlu1 %711  ;;  %v550_v14 = vpop.permute.xlu0 %549 }
 0x1ab   : > { %v716_v23 = vadd.f32 %v712_v56, %v695_v30  ;;  %v555_v58 = vadd.f32 %v550_v14, %v534_v46  ;;  %v869_v56 = vstv %s2055_s29  ;;  %v871_v14 = vstv %s2057_s10  ;;  %s956_s10 = scalar_lea.sflag [#allocation4], %s1749_s14 }
 0x1ad   : > { %v733_v60 = vadd.f32 %v1972_v40, %v716_v23  ;;  %v900_v23 = vstv %s2061_s23  ;;  %s1531_s23 = smov [#allocation16]  }
 0x1ae   : > { %v552_v0 = vpop.permute.xlu1 %551  ;;  %v571_v27 = vpop.permute.xlu0 %570 }
 0x1af   : > { %v2027_v3 = vadd.f32 %v571_v27, %v555_v58  ;;  %v556_v4 = vadd.f32 %v552_v0, %v535_v53  ;;  %v929_v58 = vstv %s2065_s12 }
 0x1b1   : > { %v578_v5 = vmax.f32 %v2027_v3, 0.0 }
 0x1b2   : > { %v573_v28 = vpop.permute.xlu1 %572  ;;  %v748_v6 = vpop.permute.xlu0 %747 }
 0x1b3   : > { %v2030_v7 = vadd.f32 %v573_v28, %v556_v4  ;;  %v812_v39 = vsel %vm783_vm5, %v578_v5, 0.0  ;;  %v753_v9 = vadd.f32 %v748_v6, %v732_v55  ;;  %v875_v6 = vstv %s2069_s19 }
 0x1b4   : > { %813 = vadd.xlane.f32.xlu1 %v812_v39  ;;  %v904_v39 = vstv %s2071_s18 }
 0x1b5   : > { %v579_v8 = vmax.f32 %v2030_v7, 0.0 }
 0x1b6   : > { %v750_v40 = vpop.permute.xlu1 %749  ;;  %v769_v11 = vpop.permute.xlu0 %768 }
 0x1b7   : > { %v2036_v10 = vadd.f32 %v769_v11, %v753_v9  ;;  %v815_v15 = vsel %vm783_vm5, %v579_v8, 0.0  ;;  %v754_v16 = vadd.f32 %v750_v40, %v733_v60  ;;  %v847_v60 = vstv %s2067_s9 }
 0x1b8   : > { %816 = vadd.xlane.f32.xlu0 %v815_v15  ;;  %v933_v9 = vstv %s2073_s21 }
 0x1b9   : > { %v776_v17 = vmax.f32 %v2036_v10, 0.0 }
 0x1ba   : > { %v771_v19 = vpop.permute.xlu1 %770 }
 0x1bb   : > { %v2042_v20 = vadd.f32 %v771_v19, %v754_v16  ;;  %v826_v22 = vsel %vm783_vm5, %v776_v17, 0.0  ;;  %v898_v19 = vstv %s2059_s15 }
 0x1bc   : > { %827 = vadd.xlane.f32.xlu1 %v826_v22  ;;  %v927_v22 = vstv %s2063_s17  ;;  %s1433_s17 = sshll.u32 %s1531_s23, 4  ;;  %s1434_s17 = int_to_ptr.vmem [resolvable:$false] %s1433_s17 }
 0x1bd   : > { %v777_v24 = vmax.f32 %v2042_v20, 0.0  ;;  %s1435_s12 = scalar_lea.vmem %s1434_s17, 2048 }
 0x1bf   : > { %v829_v25 = vsel %vm783_vm5, %v777_v24, 0.0 }
 0x1c0   : > { %830 = vadd.xlane.f32.xlu0 %v829_v25  ;;  %v851_v25 = vstv %s2075_s16 }
 0x1ec   : > { %v786_v26 = vpop.xlane.xlu0 %785 }
 0x1f0   : > { %v800_v43 = vpop.xlane.xlu0 %799 }
 0x1f4   : > { %v803_v32 = vpop.xlane.xlu0 %802 }
 0x1f5   : > { %v789_v29 = vpop.xlane.xlu1 %788  ;;  %v804_v33 = vadd.f32 %v803_v32, %v800_v43 }
 0x1f6   : > { %v790_v31 = vadd.f32 %v789_v29, %v786_v26  ;;  %v879_v26 = vstv %s2077_s1  ;;  %v908_v29 = vstv %s2079_s0  ;;  %s1188_s0 = sshll.u32 %s1598_s8, 10 }
 0x1f7   : > { %v805_v34 = vrot.slane %v804_v33, 4  ;;  %s2127_s29 = scalar_lea.hbm %s2189_s7, %s1188_s0 }
 0x1f8   : > { %v791_v51 = vrot.slane %v790_v31, 4 }
 0x1f9   : > { %v806_v37 = vadd.f32 %v805_v34, %v804_v33 }
 0x1fa   : > { %v792_v35 = vadd.f32 %v791_v51, %v790_v31  ;;  %v937_v31 = vstv %s2081_s2  ;;  %s2226_s2 = sshll.u32 %s1749_s14, 6 }
 0x1fb   : > { %v807_v41 = vrot.slane %v806_v37, 2 }
 0x1fc   : > { %v793_v38 = vrot.slane %v792_v35, 2 }
 0x1fd   : > { %v808_v1 = vadd.f32 %v807_v41, %v806_v37 }
 0x1fe   : > { %v794_v50 = vadd.f32 %v793_v38, %v792_v35 }
 0x1ff   : > { %v809_v36 = vrot.slane %v808_v1, 1 }
 0x200   : > { %v795_v18 = vrot.slane %v794_v50, 1 }
 0x201   : > { %v810_v48 = vadd.f32 %v809_v36, %v808_v1  ;;  %v883_v36 = vstv %s2091_s4 }
 0x202   : > { %v796_v62 = vadd.f32 %v795_v18, %v794_v50 }
 0x203   : > { %v811_v0 = vmul.f32 0.00390625, %v810_v48 }
 0x204   : > { %v797_v52 = vmul.f32 0.00390625, %v796_v62  ;;  %v941_v62 = vstv %s2099_s13 }
 0x205   : > { %v848_v43 = vmul.f32 %v847_v60, %v811_v0  ;;  %v876_v33 = vmul.f32 %v875_v6, %v811_v0  ;;  %v905_v51 = vmul.f32 %v904_v39, %v811_v0  ;;  %v934_v34 = vmul.f32 %v933_v9, %v811_v0 }
 0x206   : > { %v844_v28 = vmul.f32 %v843_v54, %v797_v52  ;;  %v872_v40 = vmul.f32 %v871_v14, %v797_v52  ;;  %v901_v11 = vmul.f32 %v900_v23, %v797_v52  ;;  %v930_v15 = vmul.f32 %v929_v58, %v797_v52 }
 0x208   : > { %v845_v37 = vadd.f32 %v844_v28, %v841_v13  ;;  %v873_v38 = vadd.f32 %v872_v40, %v869_v56  ;;  %v902_v41 = vadd.f32 %v901_v11, %v898_v19  ;;  %v931_v50 = vadd.f32 %v930_v15, %v927_v22 }
 0x20a   : > { %v906_v48 = vadd.f32 %v905_v51, %v902_v41 }
 0x23d   : > { %v814_v42 = vpop.xlane.xlu1 %813 }
 0x241   : > { %v817_v44 = vpop.xlane.xlu0 %816 }
 0x242   : > { %v818_v2 = vadd.f32 %v817_v44, %v814_v42  ;;  %v855_v42 = vstv %s2085_s3  ;;  %s370_s3 = scalar_lea.vmem [#allocation16], %s2226_s2 }
 0x243   : > { %s969_s4 = sshll.u32 %s370_s3, 4  ;;  %s2129_s4 = int_to_ptr.vmem [resolvable:$true] %s969_s4 }
 0x244   : > { %v819_v21 = vrot.slane %v818_v2, 4  ;;  %s1429_s15 = scalar_lea.vmem %s2129_s4, 1024  ;;  %p1436_p5 = scmp.lt.s32.totalorder %s2129_s4, %s1434_s17 }
 0x245   : > { %v828_v12 = vpop.xlane.xlu1 %827  ;;  %p1430_p1 = scmp.ne.s32.totalorder %s2129_s4, %s1429_s15  ;;  %p1437_p7 = scmp.lt.s32.totalorder %s1435_s12, %s1429_s15 }
 0x246   : > { %v820_v45 = vadd.f32 %v819_v21, %v818_v2 }
 0x247   : > { %p1431_p4 = pnand %p1430_p1, %p2227_p3  ;;  %p1438_p8 = por %p1437_p7, %p1436_p5 }
 0x248   : > { %v821_v46 = vrot.slane %v820_v45, 2 }
 0x249   : > { %v831_v47 = vpop.xlane.xlu0 %830  ;;  %p1432_p6 = pneg %p1431_p4 }
 0x24a   : > { %v822_v49 = vadd.f32 %v821_v46, %v820_v45  ;;  %v832_v53 = vadd.f32 %v831_v47, %v828_v12  ;;  %v912_v45 = vstv %s2094_s20  ;;  %v849_v12 = vadd.f32 %v848_v43, %v845_v37 }
 0x24b   : > { %v877_v47 = vadd.f32 %v876_v33, %v873_v38  ;;  %p1439_p10 = pnand %p1438_p8, %p1432_p6 }
 0x24c   : > { %v823_v30 = vrot.slane %v822_v49, 1  ;;  %v833_v55 = vrot.slane %v832_v53, 4 }
 0x24e   : > { %v824_v27 = vadd.f32 %v823_v30, %v822_v49  ;;  %v834_v4 = vadd.f32 %v833_v55, %v832_v53  ;;  %v935_v49 = vadd.f32 %v934_v34, %v931_v50 }
 0x250   : > { %v835_v16 = vrot.slane %v834_v4, 2  ;;  %v825_v32 = vmul.f32 0.00390625, %v824_v27 }
 0x252   : > { %v836_v35 = vadd.f32 %v835_v16, %v834_v4  ;;  %v852_v1 = vmul.f32 %v851_v25, %v825_v32  ;;  %v880_v2 = vmul.f32 %v879_v26, %v825_v32  ;;  %v909_v18 = vmul.f32 %v908_v29, %v825_v32 }
 0x253   : > { %v938_v21 = vmul.f32 %v937_v31, %v825_v32 }
 0x254   : > { %v837_v44 = vrot.slane %v836_v35, 1  ;;  %v853_v52 = vadd.f32 %v852_v1, %v849_v12  ;;  %v881_v13 = vadd.f32 %v880_v2, %v877_v47  ;;  %v910_v54 = vadd.f32 %v909_v18, %v906_v48 }
 0x255   : > { %v939_v30 = vadd.f32 %v938_v21, %v935_v49 }
 0x256   : > { %v838_v46 = vadd.f32 %v837_v44, %v836_v35 }
 0x258   : > { %v839_v53 = vmul.f32 0.00390625, %v838_v46 }
 0x25a   : > { %v856_v55 = vmul.f32 %v855_v42, %v839_v53  ;;  %v884_v56 = vmul.f32 %v883_v36, %v839_v53  ;;  %v913_v14 = vmul.f32 %v912_v45, %v839_v53  ;;  %v942_v23 = vmul.f32 %v941_v62, %v839_v53 }
 0x25c   : > { %v857_v58 = vadd.f32 %v856_v55, %v853_v52  ;;  %v885_v60 = vadd.f32 %v884_v56, %v881_v13  ;;  %v914_v0 = vadd.f32 %v913_v14, %v910_v54  ;;  %v943_v27 = vadd.f32 %v942_v23, %v939_v30 }
 0x25e   : > { %v1157_v4 = vmul.f32 -1.442695, %v857_v58  ;;  %v1163_v28 = vmul.f32 -1.442695, %v885_v60  ;;  %v1171_v6 = vmul.f32 -1.442695, %v914_v0 }
 0x25f   : > { %v1179_v39 = vmul.f32 -1.442695, %v943_v27 }
 0x260   : > { %1303 = vpow2.f32 %v1157_v4 }
 0x261   : > { %1305 = vpow2.f32 %v1163_v28 }
 0x262   : > { %1307 = vpow2.f32 %v1171_v6 }
 0x263   : > { %1309 = vpow2.f32 %v1179_v39 }
 0x26d   : > { %v1304_v9 = vpop.eup %1303 }
 0x26e   : > { %v1306_v40 = vpop.eup %1305  ;;  %v861_v11 = vadd.f32 1.0, %v1304_v9 }
 0x26f   : > { %v1308_v15 = vpop.eup %1307  ;;  %v889_v16 = vadd.f32 1.0, %v1306_v40 }
 0x270   : > { %v1310_v19 = vpop.eup %1309  ;;  %1311 = vrcp.f32 %v861_v11  ;;  %v918_v22 = vadd.f32 1.0, %v1308_v15 }
 0x271   : > { %1313 = vrcp.f32 %v889_v16  ;;  %v947_v25 = vadd.f32 1.0, %v1310_v19 }
 0x272   : > { %1315 = vrcp.f32 %v918_v22 }
 0x273   : > { %1317 = vrcp.f32 %v947_v25 }
 0x27d   : > { %v1312_v26 = vpop.eup %1311 }
 0x27e   : > { %v1314_v43 = vpop.eup %1313  ;;  %v864_v29 = vmul.f32 %v1312_v26, %v1996_v57  ;;  %v865_v31 = vmul.f32 %v1312_v26, %v2009_v63 }
 0x27f   : > { %v1316_v32 = vpop.eup %1315  ;;  %v892_v33 = vmul.f32 %v1314_v43, %v2001_v59  ;;  %v893_v51 = vmul.f32 %v1314_v43, %v2006_v61 }
 0x280   : > { %v1318_v34 = vpop.eup %1317  ;;  %866 = vst.msk [vmem:[%s370_s3] sm:$0xff] %vm783_vm5, %v864_v29  ;;  %867 = vst.msk [vmem:[%s370_s3 + $0x8] sm:$0xff] %vm783_vm5, %v865_v31  ;;  %v921_v35 = vmul.f32 %v1316_v32, %v578_v5  ;;  %v922_v57 = vmul.f32 %v1316_v32, %v579_v8 }
 0x281   : > { %1164 = vst.msk [vmem:[%s370_s3 + $0x10] sm:$0xff] %vm783_vm5, %v892_v33  ;;  %1165 = vst.msk [vmem:[%s370_s3 + $0x18] sm:$0xff] %vm783_vm5, %v893_v51  ;;  %v950_v59 = vmul.f32 %v1318_v34, %v776_v17  ;;  %v951_v61 = vmul.f32 %v1318_v34, %v777_v24 }
 0x282   : > { %1172 = vst.msk [vmem:[%s370_s3 + $0x20] sm:$0xff] %vm783_vm5, %v921_v35  ;;  %1173 = vst.msk [vmem:[%s370_s3 + $0x28] sm:$0xff] %vm783_vm5, %v922_v57 }
 0x283   : > { %1180 = vst.msk [vmem:[%s370_s3 + $0x30] sm:$0xff] %vm783_vm5, %v950_v59  ;;  %1181 = vst.msk [vmem:[%s370_s3 + $0x38] sm:$0xff] %vm783_vm5, %v951_v61 }
 0x284   : > { %1442 = shalt.err (!%p1439_p10)
}
 0x285   : > { %s1443_s9 = scalar_lea.hbm %s2127_s29, 1024  ;;  %s1447_s21 = scalar_lea.hbm %s2189_s7, 2048 }
 0x286   : > { %p1444_p13 = scmp.ne.s32.totalorder %s2127_s29, %s1443_s9  ;;  %p1448_p2 = scmp.lt.s32.totalorder %s2127_s29, %s2189_s7 }
 0x287   : > { %p1449_p9 = scmp.lt.s32.totalorder %s1447_s21, %s1443_s9 }
 0x288   : > { %p1445_p12 = pnand %p1444_p13, %p2227_p3 }
 0x289   : > { %p1450_p11 = por %p1449_p9, %p1448_p2 }
 0x28a   : > { %p1446_p0 = pneg %p1445_p12 }
 0x28c   : > { %p1451_p1 = pnand %p1450_p11, %p1446_p0 }
 0x28e   : > { %1454 = shalt.err (!%p1451_p1)
}
 0x28f   : > { %s1532_s13 = smov 128   ;;  %s1533_s0 = smov 8  }
 0x290   : > { %1215 = dma.vmem_to_hbm [thread:$0]  (%p2227_p3), %s2129_s4, 1024, %s2127_s29, %s956_s10, %s1532_s13, %s1532_s13, %s1533_s0  }
 0x291 PF: > { %s984_s2 = sand.u32 1, %s1505_s24   ;;  %p2228_p4 = scmp.ne.s32.totalorder %s2209_s11, 0 }
 0x292   : > { %p2229_p6 = scmp.ge.s32.totalorder %s1517_s27, 2  ;;  %s985_s3 = scalar_lea.sflag [#allocation4], %s984_s2 }
 0x294   : > { %p1241_p5 = pnand %p2229_p6, %p2228_p4 }
 0x296   : > { %p1242_p7 = pneg %p1241_p5 }
 0x298   : > { %1500 = dma.done.wait (%p1242_p7), %s985_s3, 1024  }
 0x299   : > { %1502 = vsyncadd (%p1242_p7), %s985_s3, 4294966272  ;;  %p25_p8 = scmp.ge.s32.totalorder %s1677_s22, 4   ;;  %s2230_s24 = smov %s1509_s25 }
 0x29a   : > { %s2231_s25 = smov %s1513_s26  ;;  %s2232_s26 = smov %s1688_s28 }
 0x29b   : > { %s2233_s27 = smov %s1677_s22  ;;  %27 = sbr.rel (!%p25_p8) target bundleno = 16 (0x10), region = 125 }
 0x2a0   :  { %990 = vsyncpa [#allocation3], 1 }
 0x2a1   :  { %992 = vsyncpa [#allocation3 + $0x1], 1 }
 0x2a2   :  { %993 = vsyncpa [#allocation4], 1 }
 0x2a3   :  { %995 = vsyncpa [#allocation4 + $0x1], 1 }
 0x2a4   :  { %996 = vsyncpa [#allocation5], 1 }
 0x2a5   :  { %998 = vsyncpa [#allocation5 + $0x1], 1 }
 0x2a6   :  { %999 = vsyncpa [#allocation12], 1 }
 0x2a7   :  { %1000 = vsyncpa [#allocation6], 1 }
 0x2a8   :  { %1002 = vsyncpa [#allocation6 + $0x1], 1 }
 0x2a9   :  { %1003 = vsyncpa [#allocation10], 1 }
 0x2aa   :  { %1004 = vsyncpa [#allocation15], 1 }

</bundles_post_ra>
